<compile_context>
chip_gen: v7x
topology: tpu7x:2x2x1
jax: 0.10.0
libtpu: 0.0.40
codegen_flags: <defaults>
</compile_context>

<pallas_src>
import math
from functools import partial

import jax
import jax.numpy as jnp
from jax import lax
from jax.experimental import pallas as pl
from jax.experimental.pallas import tpu as pltpu

_LANE = 128


def _round_up(v, m):
    return ((v + m - 1) // m) * m


def _dwconv_bn_act_kernel(x_ref, x_any_ref, dw_ref, pw_ref, bias_ref, o_ref, xpad_ref,
                          *, k, stride, p, th, w_in, w_out, h_in, extra_bot):
    # x_ref:    (1, th*stride, w_in, cp)   auto-pipelined body rows of one image
    # x_any_ref:(N, H, w_in, cp)           raw HBM ref, used only for the halo rows
    # dw_ref:   (k, k, cp)                 depthwise filter
    # pw_ref:   (cp, cp)                   pointwise weight with BN scale folded in
    # bias_ref: (1, cp)                    BN bias
    # o_ref:    (1, th, w_out, cp)
    # xpad_ref: (p + th*stride + extra_bot, w_in + 2p, cp)  zero-padded input tile (VMEM)
    n = pl.program_id(0)
    i = pl.program_id(1)
    body_rows = th * stride
    r0 = i * body_rows - p                       # input row of xpad_ref row 0

    r_rows, wp, cp = xpad_ref.shape

    # ---- assemble the zero-padded tile in VMEM ----
    if p > 0:  # zero the left / right column borders (image-level zero padding)
        xpad_ref[:, :p, :] = jnp.zeros((r_rows, p, cp), xpad_ref.dtype)
        xpad_ref[:, p + w_in:, :] = jnp.zeros((r_rows, wp - (p + w_in), cp),
                                              xpad_ref.dtype)

    # body rows from the auto-pipelined block
    xpad_ref[p:p + body_rows, p:p + w_in, :] = x_ref[0]

    # halo rows: DMA from HBM when inside the image, zero otherwise
    def fetch_row(dst_row, src_row):
        valid = jnp.logical_and(src_row >= 0, src_row < h_in)

        @pl.when(valid)
        def _():
            pltpu.sync_copy(x_any_ref.at[n, pl.ds(src_row, 1)],
                            xpad_ref.at[pl.ds(dst_row, 1), pl.ds(p, w_in)])

        @pl.when(jnp.logical_not(valid))
        def _():
            xpad_ref[dst_row, p:p + w_in, :] = jnp.zeros((w_in, cp), xpad_ref.dtype)

    for j in range(p):                                   # top halo rows
        fetch_row(j, r0 + j)
    for j in range(extra_bot):                           # bottom halo rows
        fetch_row(p + body_rows + j, r0 + p + body_rows + j)

    # ---- depthwise conv: k*k shifted-slice MACs on the VPU, f32 accumulation ----
    xt = xpad_ref[...].astype(jnp.float32)               # one widening cast per tile
    dw = dw_ref[...].astype(jnp.float32)
    acc = jnp.zeros((th, w_out, cp), jnp.float32)
    h_span = (th - 1) * stride + 1
    w_span = (w_out - 1) * stride + 1
    for kh in range(k):
        for kw in range(k):
            patch = xt[kh:kh + h_span:stride, kw:kw + w_span:stride, :]
            acc = acc + patch * dw[kh, kw]

    # ---- pointwise 1x1 conv on the MXU (BN scale pre-folded), bias, hardswish ----
    y = jnp.dot(acc.reshape(th * w_out, cp), pw_ref[...],
                preferred_element_type=jnp.float32)
    y = y + bias_ref[...]
    y = y * jnp.clip(y + 3.0, 0.0, 6.0) * (1.0 / 6.0)

    o_ref[0] = y.reshape(th, w_out, cp).astype(o_ref.dtype)


def _pick_block_rows(h_out, w_in, w_out, cp, stride, k, itemsize, budget_bytes):
    """Largest divisor of h_out whose double-buffered working set fits the VMEM budget."""
    p = (k - 1) // 2
    extra_bot = max(k - p - stride, 0)
    wp = w_in + 2 * p
    weight_bytes = (k * k * cp + cp * cp + cp) * 4
    best = 1
    for th in range(1, h_out + 1):
        if h_out % th:
            continue
        need = (2 * th * stride * w_in * cp * itemsize       # double-buffered body block
                + 2 * th * w_out * cp * itemsize             # double-buffered output block
                + (p + th * stride + extra_bot) * wp * cp * itemsize  # halo scratch
                + th * w_out * cp * 4                        # f32 accumulator
                + weight_bytes)
        if need <= budget_bytes:
            best = th
    return best


def dwconv2d_bn_forward(x_nhwc, dw_w, pw_w, bn_scale, bn_bias, *, k, stride,
                        block_rows=None, vmem_budget_bytes=8 * 1024 * 1024):
    """x_nhwc: (N,H,W,C); dw_w: (k,k,C); pw_w: (C_in,C_out); bn_scale/bn_bias: (C,)."""
    N, H, W, C = x_nhwc.shape
    assert dw_w.shape == (k, k, C), "depthwise weight must be (k, k, C)"
    assert pw_w.shape == (C, C), "groups=out_ch depthwise requires in_ch == out_ch"
    p = (k - 1) // 2
    h_out = (H + 2 * p - k) // stride + 1
    w_out = (W + 2 * p - k) // stride + 1
    # TODO(synk): support (H, k, stride) combos where output-row blocks overrun the image.
    assert h_out * stride <= H, "unsupported (H, k, stride) combination"

    # Fold the BN scale into the pointwise weight on the host; only the bias stays in-kernel.
    pw_scaled = pw_w * bn_scale.reshape(1, C)
    bias = bn_bias.reshape(1, C)

    # Lane-dense channels: pad C to a multiple of 128 (no-op when C % 128 == 0).
    cp = _round_up(C, _LANE)
    if cp != C:
        pc = cp - C
        x_nhwc = jnp.pad(x_nhwc, ((0, 0), (0, 0), (0, 0), (0, pc)))
        dw_w = jnp.pad(dw_w, ((0, 0), (0, 0), (0, pc)))
        pw_scaled = jnp.pad(pw_scaled, ((0, pc), (0, pc)))
        bias = jnp.pad(bias, ((0, 0), (0, pc)))

    itemsize = jnp.dtype(x_nhwc.dtype).itemsize
    if block_rows is None:
        th = _pick_block_rows(h_out, W, w_out, cp, stride, k, itemsize, vmem_budget_bytes)
    else:
        th = max(d for d in range(1, min(block_rows, h_out) + 1) if h_out % d == 0)
    nbh = h_out // th
    body_rows = th * stride
    extra_bot = max(k - p - stride, 0)
    r_rows = p + body_rows + extra_bot
    wp = W + 2 * p

    weight_bytes = (k * k * cp + cp * cp + cp) * 4
    est_vmem = (2 * body_rows * W * cp * itemsize + 2 * th * w_out * cp * itemsize
                + r_rows * wp * cp * itemsize + th * w_out * cp * 4 + weight_bytes)
    vmem_limit = int(min(60 * 1024 * 1024, max(32 * 1024 * 1024, 2 * est_vmem)))
    assert est_vmem <= vmem_limit, "chosen tile does not fit the VMEM budget"

    flops = N * h_out * w_out * cp * (2 * k * k + 2 * cp + 6)
    bytes_accessed = (N * H * W * cp + N * h_out * w_out * cp) * itemsize + weight_bytes

    kernel = partial(_dwconv_bn_act_kernel, k=k, stride=stride, p=p, th=th,
                     w_in=W, w_out=w_out, h_in=H, extra_bot=extra_bot)

    out = pl.pallas_call(
        kernel,
        out_shape=jax.ShapeDtypeStruct((N, h_out, w_out, cp), x_nhwc.dtype),
        grid=(N, nbh),
        in_specs=[
            pl.BlockSpec((1, body_rows, W, cp), lambda n, i: (n, i, 0, 0)),  # body rows
            pl.BlockSpec(memory_space=pl.ANY),                               # raw HBM (halo)
            pl.BlockSpec((k, k, cp), lambda n, i: (0, 0, 0)),                # dw weight
            pl.BlockSpec((cp, cp), lambda n, i: (0, 0)),                     # pw * BN scale
            pl.BlockSpec((1, cp), lambda n, i: (0, 0)),                      # BN bias
        ],
        out_specs=pl.BlockSpec((1, th, w_out, cp), lambda n, i: (n, i, 0, 0)),
        scratch_shapes=[pltpu.VMEM((r_rows, wp, cp), x_nhwc.dtype)],
        compiler_params=pltpu.CompilerParams(
            dimension_semantics=("parallel", "parallel"),
            vmem_limit_bytes=vmem_limit),
        cost_estimate=pl.CostEstimate(flops=int(flops), transcendentals=0,
                                      bytes_accessed=int(bytes_accessed)),
    )(x_nhwc, x_nhwc, dw_w, pw_scaled, bias)

    return out[..., :C] if cp != C else out


def reference_forward(x_nhwc, dw_w, pw_w, bn_scale, bn_bias, *, k, stride):
    """Pure-JAX reference using lax.conv (for correctness check)."""
    N, H, W, C = x_nhwc.shape
    p = (k - 1) // 2
    dn = ("NHWC", "HWIO", "NHWC")
    y = lax.conv_general_dilated(x_nhwc, dw_w.reshape(k, k, 1, C),
                                 window_strides=(stride, stride),
                                 padding=[(p, p), (p, p)],
                                 dimension_numbers=dn, feature_group_count=C)
    y = lax.conv_general_dilated(y, pw_w.reshape(1, 1, C, C),
                                 window_strides=(1, 1), padding="VALID",
                                 dimension_numbers=dn)
    y = y * bn_scale.reshape(1, 1, 1, C) + bn_bias.reshape(1, 1, 1, C)
    return y * jnp.clip(y + 3.0, 0.0, 6.0) / 6.0


if __name__ == "__main__":
    # Module config (in_ch == out_ch required by the groups=out_ch depthwise conv).
    in_ch = out_ch = 8
    kernel_size, stride = 3, 1
    bn_weight_init, eps = 1.0, 1e-5
    N, H, W = 2, 16, 16

    key = jax.random.PRNGKey(0)
    kx, kdw, kpw = jax.random.split(key, 3)

    # PyTorch-style NCHW input, moved to the kernel layout (NHWC).
    x_nchw = jax.random.normal(kx, (N, in_ch, H, W), dtype=jnp.float32)
    x_nhwc = jnp.transpose(x_nchw, (0, 2, 3, 1))

    # Parameter init matching the module's __init__ statistics:
    #   conv weights ~ N(0, sqrt(2 / (kh*kw*out_ch))), BN weight=1, bias=0.
    dw_std = math.sqrt(2.0 / (kernel_size * kernel_size * out_ch))
    pw_std = math.sqrt(2.0 / (1 * 1 * out_ch))
    dw_w = dw_std * jax.random.normal(kdw, (kernel_size, kernel_size, out_ch),
                                      dtype=jnp.float32)
    pw_w = pw_std * jax.random.normal(kpw, (out_ch, out_ch), dtype=jnp.float32)

    # BatchNorm2d (eval mode): running_mean=0, running_var=1, gamma=1, beta=0.
    gamma = jnp.full((out_ch,), bn_weight_init, jnp.float32)
    beta = jnp.zeros((out_ch,), jnp.float32)
    running_mean = jnp.zeros((out_ch,), jnp.float32)
    running_var = jnp.ones((out_ch,), jnp.float32)
    bn_scale = gamma / jnp.sqrt(running_var + eps)
    bn_bias = beta - running_mean * bn_scale

    # block_rows=8 -> 2 output-row blocks per image at this toy size, so the halo DMA and
    # the zero-padded borders are actually exercised (real shapes derive it from VMEM).
    out = dwconv2d_bn_forward(x_nhwc, dw_w, pw_w, bn_scale, bn_bias,
                              k=kernel_size, stride=stride, block_rows=8)
    out = jax.block_until_ready(out)

    ref = reference_forward(x_nhwc, dw_w, pw_w, bn_scale, bn_bias,
                            k=kernel_size, stride=stride)
    assert out.shape == ref.shape == (N, H, W, out_ch)
    assert jnp.allclose(out, ref, atol=1e-4, rtol=1e-4), "mismatch vs reference"

    print("KERNEL_OK")
</pallas_src>

<mosaic_0001>
module attributes {stable_mosaic.version = 11 : i64} {
  func.func @_dwconv_bn_act_kernel(%arg0: i32, %arg1: i32, %arg2: memref<1x8x16x128xf32, #tpu.memory_space<vmem>>, %arg3: memref<2x16x16x128xf32, #tpu.memory_space<any>>, %arg4: memref<3x3x128xf32, #tpu.memory_space<vmem>>, %arg5: memref<128x128xf32, #tpu.memory_space<vmem>>, %arg6: memref<1x128xf32, #tpu.memory_space<vmem>>, %arg7: memref<1x8x16x128xf32, #tpu.memory_space<vmem>>, %arg8: memref<10x18x128xf32, #tpu.memory_space<vmem>>) attributes {dimension_semantics = [#tpu.dimension_semantics<parallel>, #tpu.dimension_semantics<parallel>], iteration_bounds = array<i64: 2, 2>, scalar_prefetch = 0 : i64, scratch_operands = 1 : i64, tpu.core_type = #tpu.core_type<tc>, window_params = [{transform_indices = @transform_0, window_bounds = array<i64: 1, 8, 16, 128>}, {}, {pipeline_mode = #tpu.pipeline_mode<synchronous>, transform_indices = @transform_2, window_bounds = array<i64: 3, 3, 128>}, {pipeline_mode = #tpu.pipeline_mode<synchronous>, transform_indices = @transform_3, window_bounds = array<i64: 128, 128>}, {pipeline_mode = #tpu.pipeline_mode<synchronous>, transform_indices = @transform_4, window_bounds = array<i64: 1, 128>}, {transform_indices = @transform_5, window_bounds = array<i64: 1, 8, 16, 128>}]} {
    %c8_i32 = arith.constant 8 : i32
    %0 = arith.muli %arg1, %c8_i32 : i32
    %c1_i32 = arith.constant 1 : i32
    %1 = arith.subi %0, %c1_i32 : i32
    %cst = arith.constant 0.000000e+00 : f32
    %2 = vector.broadcast %cst : f32 to vector<10x1x128xf32>
    %c0 = arith.constant 0 : index
    %c0_0 = arith.constant 0 : index
    %c0_1 = arith.constant 0 : index
    %3 = vector.load %arg8[%c0, %c0_0, %c0_1] : memref<10x18x128xf32, #tpu.memory_space<vmem>>, vector<10x1x128xf32>
    tpu.vector_store %arg8[%c0, %c0_0, %c0_1], %2 {strides = array<i32>} : memref<10x18x128xf32, #tpu.memory_space<vmem>>, vector<10x1x128xf32>,
    %cst_2 = arith.constant 0.000000e+00 : f32
    %4 = vector.broadcast %cst_2 : f32 to vector<10x1x128xf32>
    %c0_3 = arith.constant 0 : index
    %c17 = arith.constant 17 : index
    %c0_4 = arith.constant 0 : index
    %5 = vector.load %arg8[%c0_3, %c17, %c0_4] : memref<10x18x128xf32, #tpu.memory_space<vmem>>, vector<10x1x128xf32>
    tpu.vector_store %arg8[%c0_3, %c17, %c0_4], %4 {strides = array<i32>} : memref<10x18x128xf32, #tpu.memory_space<vmem>>, vector<10x1x128xf32>,
    %c0_5 = arith.constant 0 : index
    %c0_6 = arith.constant 0 : index
    %c0_7 = arith.constant 0 : index
    %c0_8 = arith.constant 0 : index
    %6 = vector.load %arg2[%c0_5, %c0_6, %c0_7, %c0_8] : memref<1x8x16x128xf32, #tpu.memory_space<vmem>>, vector<1x8x16x128xf32>
    %7 = vector.shape_cast %6 : vector<1x8x16x128xf32> to vector<8x16x128xf32>
    %c1 = arith.constant 1 : index
    %c1_9 = arith.constant 1 : index
    %c0_10 = arith.constant 0 : index
    %8 = vector.load %arg8[%c1, %c1_9, %c0_10] : memref<10x18x128xf32, #tpu.memory_space<vmem>>, vector<8x16x128xf32>
    tpu.vector_store %arg8[%c1, %c1_9, %c0_10], %7 {strides = array<i32>} : memref<10x18x128xf32, #tpu.memory_space<vmem>>, vector<8x16x128xf32>,
    %c0_i32 = arith.constant 0 : i32
    %9 = arith.addi %1, %c0_i32 : i32
    %c0_i32_11 = arith.constant 0 : i32
    %10 = arith.cmpi sge, %9, %c0_i32_11 : i32
    %c16_i32 = arith.constant 16 : i32
    %11 = arith.cmpi slt, %9, %c16_i32 : i32
    %12 = arith.andi %10, %11 : i1
    %13 = arith.extui %12 : i1 to i32
    %c0_i32_12 = arith.constant 0 : i32
    %14 = arith.cmpi ne, %13, %c0_i32_12 : i32
    scf.if %14 {
      "tpu.region"() ({
        %114 = tpu.sem_alloc : memref<!tpu.dma_semaphore, #tpu.memory_space<semaphore_mem>>
        %c0_i32_42 = arith.constant 0 : i32
        %c0_i32_43 = arith.constant 0 : i32
        %115 = tpu.memref_slice %arg3[%arg0, %9, %c0_i32_42, %c0_i32_43] : memref<2x16x16x128xf32, #tpu.memory_space<any>> -> memref<1x1x16x128xf32, #tpu.memory_space<any>>
        %116 = tpu.memref_squeeze %115 : memref<1x1x16x128xf32, #tpu.memory_space<any>> -> memref<1x16x128xf32, #tpu.memory_space<any>>
        %c0_i32_44 = arith.constant 0 : i32
        %c1_i32_45 = arith.constant 1 : i32
        %c0_i32_46 = arith.constant 0 : i32
        %117 = tpu.memref_slice %arg8[%c0_i32_44, %c1_i32_45, %c0_i32_46] : memref<10x18x128xf32, #tpu.memory_space<vmem>> -> memref<1x16x128xf32, #tpu.memory_space<vmem>>
        tpu.enqueue_dma source(%116 : memref<1x16x128xf32, #tpu.memory_space<any>>) target(%117 : memref<1x16x128xf32, #tpu.memory_space<vmem>>) target_semaphore(%114 : memref<!tpu.dma_semaphore, #tpu.memory_space<semaphore_mem>>)
        %c0_i32_47 = arith.constant 0 : i32
        %c0_i32_48 = arith.constant 0 : i32
        %118 = tpu.memref_slice %arg3[%arg0, %9, %c0_i32_47, %c0_i32_48] : memref<2x16x16x128xf32, #tpu.memory_space<any>> -> memref<1x1x16x128xf32, #tpu.memory_space<any>>
        %119 = tpu.memref_squeeze %118 : memref<1x1x16x128xf32, #tpu.memory_space<any>> -> memref<1x16x128xf32, #tpu.memory_space<any>>
        %c0_i32_49 = arith.constant 0 : i32
        %c1_i32_50 = arith.constant 1 : i32
        %c0_i32_51 = arith.constant 0 : i32
        %120 = tpu.memref_slice %arg8[%c0_i32_49, %c1_i32_50, %c0_i32_51] : memref<10x18x128xf32, #tpu.memory_space<vmem>> -> memref<1x16x128xf32, #tpu.memory_space<vmem>>
        tpu.wait_dma2 semaphore(%114 : memref<!tpu.dma_semaphore, #tpu.memory_space<semaphore_mem>>) src(%119 : memref<1x16x128xf32, #tpu.memory_space<any>>) dst(%120 : memref<1x16x128xf32, #tpu.memory_space<vmem>>)
        tpu.yield
      }) : () -> ()
    } else {
    }
    %true = arith.constant true
    %15 = arith.xori %12, %true : i1
    %16 = arith.extui %15 : i1 to i32
    %c0_i32_13 = arith.constant 0 : i32
    %17 = arith.cmpi ne, %16, %c0_i32_13 : i32
    scf.if %17 {
      %cst_42 = arith.constant 0.000000e+00 : f32
      %114 = vector.broadcast %cst_42 : f32 to vector<16x128xf32>
      %c0_43 = arith.constant 0 : index
      %c1_44 = arith.constant 1 : index
      %c0_45 = arith.constant 0 : index
      %115 = vector.load %arg8[%c0_43, %c1_44, %c0_45] : memref<10x18x128xf32, #tpu.memory_space<vmem>>, vector<1x16x128xf32>
      %116 = vector.shape_cast %115 : vector<1x16x128xf32> to vector<16x128xf32>
      %117 = vector.shape_cast %114 : vector<16x128xf32> to vector<1x16x128xf32>
      tpu.vector_store %arg8[%c0_43, %c1_44, %c0_45], %117 {strides = array<i32>} : memref<10x18x128xf32, #tpu.memory_space<vmem>>, vector<1x16x128xf32>,
    } else {
    }
    %c1_i32_14 = arith.constant 1 : i32
    %18 = arith.addi %1, %c1_i32_14 : i32
    %c8_i32_15 = arith.constant 8 : i32
    %19 = arith.addi %18, %c8_i32_15 : i32
    %c0_i32_16 = arith.constant 0 : i32
    %20 = arith.addi %19, %c0_i32_16 : i32
    %c0_i32_17 = arith.constant 0 : i32
    %21 = arith.cmpi sge, %20, %c0_i32_17 : i32
    %c16_i32_18 = arith.constant 16 : i32
    %22 = arith.cmpi slt, %20, %c16_i32_18 : i32
    %23 = arith.andi %21, %22 : i1
    %24 = arith.extui %23 : i1 to i32
    %c0_i32_19 = arith.constant 0 : i32
    %25 = arith.cmpi ne, %24, %c0_i32_19 : i32
    scf.if %25 {
      "tpu.region"() ({
        %114 = tpu.sem_alloc : memref<!tpu.dma_semaphore, #tpu.memory_space<semaphore_mem>>
        %c0_i32_42 = arith.constant 0 : i32
        %c0_i32_43 = arith.constant 0 : i32
        %115 = tpu.memref_slice %arg3[%arg0, %20, %c0_i32_42, %c0_i32_43] : memref<2x16x16x128xf32, #tpu.memory_space<any>> -> memref<1x1x16x128xf32, #tpu.memory_space<any>>
        %116 = tpu.memref_squeeze %115 : memref<1x1x16x128xf32, #tpu.memory_space<any>> -> memref<1x16x128xf32, #tpu.memory_space<any>>
        %c9_i32 = arith.constant 9 : i32
        %c1_i32_44 = arith.constant 1 : i32
        %c0_i32_45 = arith.constant 0 : i32
        %117 = tpu.memref_slice %arg8[%c9_i32, %c1_i32_44, %c0_i32_45] : memref<10x18x128xf32, #tpu.memory_space<vmem>> -> memref<1x16x128xf32, #tpu.memory_space<vmem>>
        tpu.enqueue_dma source(%116 : memref<1x16x128xf32, #tpu.memory_space<any>>) target(%117 : memref<1x16x128xf32, #tpu.memory_space<vmem>>) target_semaphore(%114 : memref<!tpu.dma_semaphore, #tpu.memory_space<semaphore_mem>>)
        %c0_i32_46 = arith.constant 0 : i32
        %c0_i32_47 = arith.constant 0 : i32
        %118 = tpu.memref_slice %arg3[%arg0, %20, %c0_i32_46, %c0_i32_47] : memref<2x16x16x128xf32, #tpu.memory_space<any>> -> memref<1x1x16x128xf32, #tpu.memory_space<any>>
        %119 = tpu.memref_squeeze %118 : memref<1x1x16x128xf32, #tpu.memory_space<any>> -> memref<1x16x128xf32, #tpu.memory_space<any>>
        %c9_i32_48 = arith.constant 9 : i32
        %c1_i32_49 = arith.constant 1 : i32
        %c0_i32_50 = arith.constant 0 : i32
        %120 = tpu.memref_slice %arg8[%c9_i32_48, %c1_i32_49, %c0_i32_50] : memref<10x18x128xf32, #tpu.memory_space<vmem>> -> memref<1x16x128xf32, #tpu.memory_space<vmem>>
        tpu.wait_dma2 semaphore(%114 : memref<!tpu.dma_semaphore, #tpu.memory_space<semaphore_mem>>) src(%119 : memref<1x16x128xf32, #tpu.memory_space<any>>) dst(%120 : memref<1x16x128xf32, #tpu.memory_space<vmem>>)
        tpu.yield
      }) : () -> ()
    } else {
    }
    %true_20 = arith.constant true
    %26 = arith.xori %23, %true_20 : i1
    %27 = arith.extui %26 : i1 to i32
    %c0_i32_21 = arith.constant 0 : i32
    %28 = arith.cmpi ne, %27, %c0_i32_21 : i32
    scf.if %28 {
      %cst_42 = arith.constant 0.000000e+00 : f32
      %114 = vector.broadcast %cst_42 : f32 to vector<16x128xf32>
      %c9 = arith.constant 9 : index
      %c1_43 = arith.constant 1 : index
      %c0_44 = arith.constant 0 : index
      %115 = vector.load %arg8[%c9, %c1_43, %c0_44] : memref<10x18x128xf32, #tpu.memory_space<vmem>>, vector<1x16x128xf32>
      %116 = vector.shape_cast %115 : vector<1x16x128xf32> to vector<16x128xf32>
      %117 = vector.shape_cast %114 : vector<16x128xf32> to vector<1x16x128xf32>
      tpu.vector_store %arg8[%c9, %c1_43, %c0_44], %117 {strides = array<i32>} : memref<10x18x128xf32, #tpu.memory_space<vmem>>, vector<1x16x128xf32>,
    } else {
    }
    %c0_22 = arith.constant 0 : index
    %c0_23 = arith.constant 0 : index
    %c0_24 = arith.constant 0 : index
    %29 = vector.load %arg8[%c0_22, %c0_23, %c0_24] : memref<10x18x128xf32, #tpu.memory_space<vmem>>, vector<10x18x128xf32>
    %c0_25 = arith.constant 0 : index
    %c0_26 = arith.constant 0 : index
    %c0_27 = arith.constant 0 : index
    %30 = vector.load %arg4[%c0_25, %c0_26, %c0_27] : memref<3x3x128xf32, #tpu.memory_space<vmem>>, vector<3x3x128xf32>
    %cst_28 = arith.constant 0.000000e+00 : f32
    %31 = vector.broadcast %cst_28 : f32 to vector<8x16x128xf32>
    %32 = vector.extract_strided_slice %29 {offsets = [0, 0, 0], sizes = [8, 16, 128], strides = [1, 1, 1]} : vector<10x18x128xf32> to vector<8x16x128xf32>
    %33 = vector.extract_strided_slice %30 {offsets = [0, 0, 0], sizes = [1, 1, 128], strides = [1, 1, 1]} : vector<3x3x128xf32> to vector<1x1x128xf32>
    %34 = vector.shape_cast %33 : vector<1x1x128xf32> to vector<128xf32>
    %35 = vector.shape_cast %34 : vector<128xf32> to vector<1x1x128xf32>
    %36 = vector.broadcast %35 : vector<1x1x128xf32> to vector<8x16x128xf32>
    %37 = arith.mulf %32, %36 : vector<8x16x128xf32>
    %38 = arith.addf %31, %37 : vector<8x16x128xf32>
    %39 = vector.extract_strided_slice %29 {offsets = [0, 1, 0], sizes = [8, 16, 128], strides = [1, 1, 1]} : vector<10x18x128xf32> to vector<8x16x128xf32>
    %40 = vector.extract_strided_slice %30 {offsets = [0, 1, 0], sizes = [1, 1, 128], strides = [1, 1, 1]} : vector<3x3x128xf32> to vector<1x1x128xf32>
    %41 = vector.shape_cast %40 : vector<1x1x128xf32> to vector<128xf32>
    %42 = vector.shape_cast %41 : vector<128xf32> to vector<1x1x128xf32>
    %43 = vector.broadcast %42 : vector<1x1x128xf32> to vector<8x16x128xf32>
    %44 = arith.mulf %39, %43 : vector<8x16x128xf32>
    %45 = arith.addf %38, %44 : vector<8x16x128xf32>
    %46 = vector.extract_strided_slice %29 {offsets = [0, 2, 0], sizes = [8, 16, 128], strides = [1, 1, 1]} : vector<10x18x128xf32> to vector<8x16x128xf32>
    %47 = vector.extract_strided_slice %30 {offsets = [0, 2, 0], sizes = [1, 1, 128], strides = [1, 1, 1]} : vector<3x3x128xf32> to vector<1x1x128xf32>
    %48 = vector.shape_cast %47 : vector<1x1x128xf32> to vector<128xf32>
    %49 = vector.shape_cast %48 : vector<128xf32> to vector<1x1x128xf32>
    %50 = vector.broadcast %49 : vector<1x1x128xf32> to vector<8x16x128xf32>
    %51 = arith.mulf %46, %50 : vector<8x16x128xf32>
    %52 = arith.addf %45, %51 : vector<8x16x128xf32>
    %53 = vector.extract_strided_slice %29 {offsets = [1, 0, 0], sizes = [8, 16, 128], strides = [1, 1, 1]} : vector<10x18x128xf32> to vector<8x16x128xf32>
    %54 = vector.extract_strided_slice %30 {offsets = [1, 0, 0], sizes = [1, 1, 128], strides = [1, 1, 1]} : vector<3x3x128xf32> to vector<1x1x128xf32>
    %55 = vector.shape_cast %54 : vector<1x1x128xf32> to vector<128xf32>
    %56 = vector.shape_cast %55 : vector<128xf32> to vector<1x1x128xf32>
    %57 = vector.broadcast %56 : vector<1x1x128xf32> to vector<8x16x128xf32>
    %58 = arith.mulf %53, %57 : vector<8x16x128xf32>
    %59 = arith.addf %52, %58 : vector<8x16x128xf32>
    %60 = vector.extract_strided_slice %29 {offsets = [1, 1, 0], sizes = [8, 16, 128], strides = [1, 1, 1]} : vector<10x18x128xf32> to vector<8x16x128xf32>
    %61 = vector.extract_strided_slice %30 {offsets = [1, 1, 0], sizes = [1, 1, 128], strides = [1, 1, 1]} : vector<3x3x128xf32> to vector<1x1x128xf32>
    %62 = vector.shape_cast %61 : vector<1x1x128xf32> to vector<128xf32>
    %63 = vector.shape_cast %62 : vector<128xf32> to vector<1x1x128xf32>
    %64 = vector.broadcast %63 : vector<1x1x128xf32> to vector<8x16x128xf32>
    %65 = arith.mulf %60, %64 : vector<8x16x128xf32>
    %66 = arith.addf %59, %65 : vector<8x16x128xf32>
    %67 = vector.extract_strided_slice %29 {offsets = [1, 2, 0], sizes = [8, 16, 128], strides = [1, 1, 1]} : vector<10x18x128xf32> to vector<8x16x128xf32>
    %68 = vector.extract_strided_slice %30 {offsets = [1, 2, 0], sizes = [1, 1, 128], strides = [1, 1, 1]} : vector<3x3x128xf32> to vector<1x1x128xf32>
    %69 = vector.shape_cast %68 : vector<1x1x128xf32> to vector<128xf32>
    %70 = vector.shape_cast %69 : vector<128xf32> to vector<1x1x128xf32>
    %71 = vector.broadcast %70 : vector<1x1x128xf32> to vector<8x16x128xf32>
    %72 = arith.mulf %67, %71 : vector<8x16x128xf32>
    %73 = arith.addf %66, %72 : vector<8x16x128xf32>
    %74 = vector.extract_strided_slice %29 {offsets = [2, 0, 0], sizes = [8, 16, 128], strides = [1, 1, 1]} : vector<10x18x128xf32> to vector<8x16x128xf32>
    %75 = vector.extract_strided_slice %30 {offsets = [2, 0, 0], sizes = [1, 1, 128], strides = [1, 1, 1]} : vector<3x3x128xf32> to vector<1x1x128xf32>
    %76 = vector.shape_cast %75 : vector<1x1x128xf32> to vector<128xf32>
    %77 = vector.shape_cast %76 : vector<128xf32> to vector<1x1x128xf32>
    %78 = vector.broadcast %77 : vector<1x1x128xf32> to vector<8x16x128xf32>
    %79 = arith.mulf %74, %78 : vector<8x16x128xf32>
    %80 = arith.addf %73, %79 : vector<8x16x128xf32>
    %81 = vector.extract_strided_slice %29 {offsets = [2, 1, 0], sizes = [8, 16, 128], strides = [1, 1, 1]} : vector<10x18x128xf32> to vector<8x16x128xf32>
    %82 = vector.extract_strided_slice %30 {offsets = [2, 1, 0], sizes = [1, 1, 128], strides = [1, 1, 1]} : vector<3x3x128xf32> to vector<1x1x128xf32>
    %83 = vector.shape_cast %82 : vector<1x1x128xf32> to vector<128xf32>
    %84 = vector.shape_cast %83 : vector<128xf32> to vector<1x1x128xf32>
    %85 = vector.broadcast %84 : vector<1x1x128xf32> to vector<8x16x128xf32>
    %86 = arith.mulf %81, %85 : vector<8x16x128xf32>
    %87 = arith.addf %80, %86 : vector<8x16x128xf32>
    %88 = vector.extract_strided_slice %29 {offsets = [2, 2, 0], sizes = [8, 16, 128], strides = [1, 1, 1]} : vector<10x18x128xf32> to vector<8x16x128xf32>
    %89 = vector.extract_strided_slice %30 {offsets = [2, 2, 0], sizes = [1, 1, 128], strides = [1, 1, 1]} : vector<3x3x128xf32> to vector<1x1x128xf32>
    %90 = vector.shape_cast %89 : vector<1x1x128xf32> to vector<128xf32>
    %91 = vector.shape_cast %90 : vector<128xf32> to vector<1x1x128xf32>
    %92 = vector.broadcast %91 : vector<1x1x128xf32> to vector<8x16x128xf32>
    %93 = arith.mulf %88, %92 : vector<8x16x128xf32>
    %94 = arith.addf %87, %93 : vector<8x16x128xf32>
    %95 = vector.shape_cast %94 : vector<8x16x128xf32> to vector<128x128xf32>
    %c0_29 = arith.constant 0 : index
    %c0_30 = arith.constant 0 : index
    %96 = vector.load %arg5[%c0_29, %c0_30] : memref<128x128xf32, #tpu.memory_space<vmem>>, vector<128x128xf32>
    %cst_31 = arith.constant dense<0.000000e+00> : vector<128x128xf32>
    %97 = tpu.matmul %95, %96, %cst_31 {dimension_numbers = #tpu.dot_dimension_numbers<[1], [0], [0], [1], [0, 0, 1, 1], [], []>} : vector<128x128xf32>, vector<128x128xf32>, vector<128x128xf32> -> vector<128x128xf32>
    %c0_32 = arith.constant 0 : index
    %c0_33 = arith.constant 0 : index
    %98 = vector.load %arg6[%c0_32, %c0_33] : memref<1x128xf32, #tpu.memory_space<vmem>>, vector<1x128xf32>
    %99 = vector.broadcast %98 : vector<1x128xf32> to vector<128x128xf32>
    %100 = arith.addf %97, %99 : vector<128x128xf32>
    %cst_34 = arith.constant 3.000000e+00 : f32
    %101 = vector.broadcast %cst_34 : f32 to vector<128x128xf32>
    %102 = arith.addf %100, %101 : vector<128x128xf32>
    %cst_35 = arith.constant 0.000000e+00 : f32
    %cst_36 = arith.constant 6.000000e+00 : f32
    %103 = vector.broadcast %cst_35 : f32 to vector<128x128xf32>
    %104 = arith.maximumf %103, %102 : vector<128x128xf32>
    %105 = vector.broadcast %cst_36 : f32 to vector<128x128xf32>
    %106 = arith.minimumf %105, %104 : vector<128x128xf32>
    %107 = arith.mulf %100, %106 : vector<128x128xf32>
    %cst_37 = arith.constant 0.166666672 : f32
    %108 = vector.broadcast %cst_37 : f32 to vector<128x128xf32>
    %109 = arith.mulf %107, %108 : vector<128x128xf32>
    %110 = vector.shape_cast %109 : vector<128x128xf32> to vector<8x16x128xf32>
    %c0_38 = arith.constant 0 : index
    %c0_39 = arith.constant 0 : index
    %c0_40 = arith.constant 0 : index
    %c0_41 = arith.constant 0 : index
    %111 = vector.load %arg7[%c0_38, %c0_39, %c0_40, %c0_41] : memref<1x8x16x128xf32, #tpu.memory_space<vmem>>, vector<1x8x16x128xf32>
    %112 = vector.shape_cast %111 : vector<1x8x16x128xf32> to vector<8x16x128xf32>
    %113 = vector.shape_cast %110 : vector<8x16x128xf32> to vector<1x8x16x128xf32>
    tpu.vector_store %arg7[%c0_38, %c0_39, %c0_40, %c0_41], %113 {strides = array<i32>} : memref<1x8x16x128xf32, #tpu.memory_space<vmem>>, vector<1x8x16x128xf32>,
    return
  }
  func.func @transform_0(%arg0: i32, %arg1: i32) -> (i32, i32, i32, i32) {
    %c0_i32 = arith.constant 0 : i32
    %c0_i32_0 = arith.constant 0 : i32
    %c0_i32_1 = arith.constant 0 : i32
    return %arg0, %arg1, %c0_i32, %c0_i32_0 : i32, i32, i32, i32
  }
  func.func @transform_2(%arg0: i32, %arg1: i32) -> (i32, i32, i32) {
    %c0_i32 = arith.constant 0 : i32
    %c0_i32_0 = arith.constant 0 : i32
    %c0_i32_1 = arith.constant 0 : i32
    %c0_i32_2 = arith.constant 0 : i32
    return %c0_i32, %c0_i32_0, %c0_i32_1 : i32, i32, i32
  }
  func.func @transform_3(%arg0: i32, %arg1: i32) -> (i32, i32) {
    %c0_i32 = arith.constant 0 : i32
    %c0_i32_0 = arith.constant 0 : i32
    %c0_i32_1 = arith.constant 0 : i32
    return %c0_i32, %c0_i32_0 : i32, i32
  }
  func.func @transform_4(%arg0: i32, %arg1: i32) -> (i32, i32) {
    %c0_i32 = arith.constant 0 : i32
    %c0_i32_0 = arith.constant 0 : i32
    %c0_i32_1 = arith.constant 0 : i32
    return %c0_i32, %c0_i32_0 : i32, i32
  }
  func.func @transform_5(%arg0: i32, %arg1: i32) -> (i32, i32, i32, i32) {
    %c0_i32 = arith.constant 0 : i32
    %c0_i32_0 = arith.constant 0 : i32
    %c0_i32_1 = arith.constant 0 : i32
    return %arg0, %arg1, %c0_i32, %c0_i32_0 : i32, i32, i32, i32
  }
}

</mosaic_0001>

<bundles_post_ra>
// kernel: tpu_custom_call.1
= control target key start
LH: loop header
LB: loop body
LE: loop exit
PB: predicated region body
PF: predicated region fallthrough
CT: control target
= control target key end

     0   :  { %s3545_s0 = inlined_call_operand.hbm [shape: f32[2,16,16,128], index: 0, kind: input, shape index: {}]   ;;  %s3546_s1 = inlined_call_operand.hbm [shape: f32[2,16,16,128], index: 1, kind: input, shape index: {}]   ;;  %s3547_s2 = inlined_call_operand.hbm [shape: f32[3,3,128], index: 2, kind: input, shape index: {}]   ;;  %s3548_s3 = inlined_call_operand.hbm [shape: f32[128,128], index: 3, kind: input, shape index: {}]   ;;  %s3549_s4 = inlined_call_operand.vmem [shape: f32[1,128], index: 4, kind: input, shape index: {}]   ;;  %s3550_s5 = inlined_call_operand.hbm [shape: f32[2,16,16,128], index: 5, kind: output, shape index: {}]  }
   0x1   :  { %3578 = sst [smem:[#allocation27_spill]] %s3547_s2 }
   0x2   :  { %3579 = sst [smem:[#allocation28_spill]] %s3548_s3 }
   0x3   :  { %3580 = sst [smem:[#allocation29_spill]] %s3550_s5 }
   0x4   :  { %10 = vsyncpa [#allocation4], 0 }
   0x5   :  { %12 = vsyncpa [#allocation4 + $0x1], 0 }
   0x6   :  { %13 = vsyncpa [#allocation7], 0 }
   0x7   :  { %14 = vsyncpa [#allocation5], 0 }
   0x8   :  { %16 = vsyncpa [#allocation5 + $0x1], 0  ;;  %s2251_s18 = smov 0   ;;  %s2253_s19 = smov 0  }
   0x9   :  { %s2255_s20 = smov 0   ;;  %s2257_s21 = smov 0  }
   0xa   :  { %s2259_s22 = smov 0   ;;  %s2261_s23 = smov 0  }
   0xb   :  { %s2263_s24 = smov 0   ;;  %s2265_s25 = smov 0  }
   0xc LB: > { %3581 = sst [smem:[#allocation23_spill]] %s2174_s18  ;;  %s1677_s26 = sadd.s32 4294967295, %s2202_s25   ;;  %s2202_s25 = sphi %s2265_s25, %s22_s25   ;;  %s2198_s24 = sphi %s2263_s24, %s3631_s24   ;;  %s2194_s23 = sphi %s2261_s23, %s3630_s23   ;;  %s2190_s22 = sphi %s2259_s22, %s3629_s22   ;;  %s2186_s21 = sphi %s2257_s21, %s3628_s21   ;;  %s2182_s20 = sphi %s2255_s20, %s3627_s20   ;;  %s2178_s19 = sphi %s2253_s19, %s3626_s19   ;;  %s2174_s18 = sphi %s2251_s18, %s3625_s18  }
   0xd   : > { %s1678_s27 = sadd.s32 4294967294, %s2202_s25   ;;  %p56_p0 = scmp.ne.s32.totalorder %s2178_s19, %s2174_s18 }
   0xe   : > { %p2295_p1 = scmp.eq.s32.totalorder %s1677_s26, 0  ;;  %p2299_p2 = scmp.eq.s32.totalorder %s1677_s26, 3 }
   0xf   : > { %p151_p3 = scmp.eq.s32.totalorder %s1678_s27, 3  ;;  %p1679_p5 = scmp.ge.s32.totalorder %s2202_s25, 1 }
  0x10   : > { %s3582_s28 = scalar_select %p2295_p1, 1, 0 }
  0x11   : > { %s3583_s29 = scalar_select %p2299_p2, 1, 0 }
  0x12   : > { %p2305_p4 = por %p2295_p1, %p56_p0  ;;  %p2310_p6 = por %p151_p3, %p56_p0 }
  0x13   : > { %p158_p7 = scmp.lt.s32.totalorder %s2202_s25, 5  ;;  %s2204_s8 = smov [#allocation6]  }
  0x14   : > { %s3584_s30 = scalar_select %p2305_p4, 1, 0 }
  0x15   : > { %s3585_s6 = scalar_select %p2310_p6, 1, 0 }
  0x16   : > { %p2315_p8 = pnand %p1679_p5, %p158_p7  ;;  %s170_s9 = sshll.u32 %s2204_s8, 4  ;;  %s171_s9 = int_to_ptr.vmem [resolvable:$true] %s170_s9 }
  0x17   : > { %3586 = sst [smem:[#allocation24_spill]] %s3585_s6  ;;  %s2205_s11 = smov [#allocation8]  }
  0x18   : > { %s3587_s7 = scalar_select %p2315_p8, 1, 0 }
  0x19   : > { %p1861_p9 = pneg %p2315_p8  ;;  %s183_s12 = sshll.u32 %s2205_s11, 4  ;;  %s2327_s12 = int_to_ptr.vmem [resolvable:$true] %s183_s12 }
  0x1a   : > { %s3589_s2 = sld [smem:[#allocation27_spill]] }
  0x1b   : > { %p2323_p10 = pnand %p1861_p9, %p2295_p1 }
  0x1d   : > { %p1963_p12 = pneg %p2323_p10 }
  0x20   : > { %s1961_s15 = scalar_lea.hbm %s3589_s2, 192 }
  0x21   : > { %p1962_p11 = scmp.ne.s32.totalorder %s3589_s2, %s1961_s15  ;;  %p1968_p3 = scmp.lt.u32.totalorder %s1961_s15, %s3589_s2 }
  0x23   : > { %p1964_p13 = pnand %p1963_p12, %p1962_p11 }
  0x25   : > { %p1965_p0 = pneg %p1964_p13 }
  0x27   : > { %p1970_p5 = pnand %p1968_p3, %p1965_p0 }
  0x29   : > { %1973 = shalt.err (!%p1970_p5)
}
  0x2a   : > { %s1974_s8 = scalar_lea.vmem %s171_s9, 192  ;;  %p1982_p1 = scmp.lt.s32.totalorder %s171_s9, %s171_s9 }
  0x2b   : > { %p1975_p7 = scmp.ne.s32.totalorder %s171_s9, %s1974_s8  ;;  %p1983_p4 = scmp.lt.s32.totalorder %s1974_s8, %s1974_s8 }
  0x2d   : > { %p1977_p9 = pnand %p1975_p7, %p1963_p12  ;;  %p1984_p8 = por %p1983_p4, %p1982_p1 }
  0x2f   : > { %p1978_p6 = pneg %p1977_p9 }
  0x31   : > { %p1985_p2 = pnand %p1984_p8, %p1978_p6 }
  0x33   : > { %1988 = shalt.err (!%p1985_p2)
}
  0x34   : > { %s2206_s11 = smov 64   ;;  %s2207_s13 = smov 4  }
  0x35   : > { %1864 = dma.hbm_to_vmem [thread:$0]  (!%p2323_p10), %s3589_s2, 192, %s171_s9, [#allocation7], %s2206_s11, %s2206_s11, %s2207_s13  }
  0x36   : > { %s3590_s3 = sld [smem:[#allocation28_spill]] }
  0x3c   : > { %s1989_s26 = scalar_lea.hbm %s3590_s3, 2048 }
  0x3d   : > { %p1990_p11 = scmp.ne.s32.totalorder %s3590_s3, %s1989_s26  ;;  %p1996_p4 = scmp.lt.u32.totalorder %s1989_s26, %s3590_s3 }
  0x3f   : > { %p1992_p1 = pnand %p1990_p11, %p1963_p12 }
  0x41   : > { %p1993_p2 = pneg %p1992_p1 }
  0x43   : > { %p1998_p6 = pnand %p1996_p4, %p1993_p2 }
  0x45   : > { %2001 = shalt.err (!%p1998_p6)
}
  0x46   : > { %s2002_s9 = scalar_lea.vmem %s2327_s12, 2048  ;;  %p2010_p3 = scmp.lt.s32.totalorder %s2327_s12, %s2327_s12 }
  0x47   : > { %p2003_p8 = scmp.ne.s32.totalorder %s2327_s12, %s2002_s9  ;;  %p2011_p5 = scmp.lt.s32.totalorder %s2002_s9, %s2002_s9 }
  0x49   : > { %p2005_p13 = pnand %p2003_p8, %p1963_p12  ;;  %p2012_p7 = por %p2011_p5, %p2010_p3 }
  0x4b   : > { %p2006_p0 = pneg %p2005_p13 }
  0x4d   : > { %p2013_p9 = pnand %p2012_p7, %p2006_p0 }
  0x4f   : > { %2016 = shalt.err (!%p2013_p9)
}
  0x50   : > { %s3557_s18 = smov 128   ;;  %s3558_s6 = smov 8  }
  0x51   : > { %1867 = dma.hbm_to_vmem [thread:$0]  (!%p2323_p10), %s3590_s3, 2048, %s2327_s12, [#allocation7], %s3557_s18, %s3557_s18, %s3558_s6  }
  0x52   : > { %s31_s14 = sadd.s32 1, %s2194_s23  ;;  %s34_s15 = sadd.s32 1, %s2198_s24 }
  0x53   : > { %p32_p12 = scmp.ge.s32.totalorder %s31_s14, 2  ;;  %s43_s16 = sadd.s32 1, %s2182_s20 }
  0x54   : > { %p50_p11 = scmp.ne.s32.totalorder %s2182_s20, %s2178_s19  ;;  %p51_p1 = scmp.eq.s32.totalorder %s2202_s25, 0 }
  0x55   : > { %s3633_s14 = smov (%p32_p12, %s31_s14), 0  ;;  %s3635_s15 = smov (!%p32_p12, %s34_s15), %s2198_s24 }
  0x56   : > { %3591 = sst [smem:[#allocation25_spill]] %s3633_s14  ;;  %s39_s10 = ssub.s32 %s2194_s23, %s3633_s14 }
  0x57   : > { %p2390_p2 = por %p51_p1, %p50_p11  ;;  %p36_p10 = scmp.ge.s32.totalorder %s3635_s15, 2 }
  0x58   : > { %p3593_p4 = scmp.ne.s32.totalorder %s3583_s29, 0  ;;  %p1878_p8 = scmp.lt.s32.totalorder %s2202_s25, 4 }
  0x59   : > { %s200_s26 = sand.u32 1, %s2182_s20   ;;  %s3637_s15 = smov (%p36_p10, %s3635_s15), 0 }
  0x5a   : > { %p2396_p6 = por %p3593_p4, %p50_p11  ;;  %s1683_s27 = sshll.u32 %s200_s26, 7 }
  0x5b   : > { %s38_s8 = ssub.s32 %s2198_s24, %s3637_s15  ;;  %s1710_s11 = sshll.u32 %s2194_s23, 4 }
  0x5c   : > { %s3594_s12 = scalar_select %p2396_p6, 1, 0 }
  0x5d   : > { %s40_s9 = sor.u32 %s39_s10, %s38_s8  ;;  %s1686_s13 = sshll.u32 %s2198_s24, 5 }
  0x5e   : > { %3595 = sst [smem:[#allocation26_spill]] %s3594_s12  ;;  %p41_p13 = scmp.eq.s32.totalorder %s40_s9, 0 }
  0x5f   : > { %s211_s18 = sadd.s32 %s1710_s11, %s1686_s13  ;;  %s204_s6 = scalar_lea.vmem [#allocation3], %s1683_s27 }
  0x60   : > { %s214_s29 = sshll.u32 %s204_s6, 4  ;;  %s1687_s3 = sshll.u32 %s211_s18, 7  ;;  %s2411_s29 = int_to_ptr.vmem [resolvable:$true] %s214_s29 }
  0x61   : > { %s2409_s2 = scalar_select %p41_p13, %s2182_s20, %s43_s16  }
  0x62   : > { %s2416_s12 = scalar_lea.hbm %s3545_s0, %s1687_s3  ;;  %p2422_p0 = pnand %p1878_p8, %p2390_p2 }
  0x63   : > { %s2426_s18 = scalar_lea.sflag [#allocation4], %s200_s26  ;;  %s2017_s6 = scalar_lea.hbm %s2416_s12, 2048 }
  0x64   : > { %p2018_p3 = scmp.ne.s32.totalorder %s2416_s12, %s2017_s6  ;;  %p2019_p5 = pneg %p2422_p0 }
  0x65   : > { %s2022_s14 = scalar_lea.hbm %s3545_s0, 8192  ;;  %p2023_p12 = scmp.lt.u32.totalorder %s2416_s12, %s3545_s0 }
  0x66   : > { %p2020_p7 = pnand %p2019_p5, %p2018_p3  ;;  %p2024_p11 = scmp.lt.u32.totalorder %s2022_s14, %s2017_s6 }
  0x67   : > { %p2026_p2 = scmp.lt.u32.totalorder %s2017_s6, %s2416_s12 }
  0x68   : > { %p2021_p9 = pneg %p2020_p7  ;;  %p2025_p1 = por %p2024_p11, %p2023_p12 }
  0x6a   : > { %p2027_p10 = por %p2026_p2, %p2025_p1 }
  0x6c   : > { %p2028_p4 = pnand %p2027_p10, %p2021_p9 }
  0x6e   : > { %2031 = shalt.err (!%p2028_p4)
}
  0x6f   : > { %s2032_s26 = scalar_lea.vmem %s2411_s29, 2048  ;;  %s2210_s27 = smov [#allocation3]  }
  0x70   : > { %p2033_p8 = scmp.ne.s32.totalorder %s2411_s29, %s2032_s26  ;;  %s2037_s8 = sshll.u32 %s2210_s27, 4  ;;  %s2038_s8 = int_to_ptr.vmem [resolvable:$false] %s2037_s8 }
  0x71   : > { %s2039_s9 = scalar_lea.vmem %s2038_s8, 4096  ;;  %p2040_p7 = scmp.lt.s32.totalorder %s2411_s29, %s2038_s8 }
  0x72   : > { %p2035_p13 = pnand %p2033_p8, %p2019_p5  ;;  %p2041_p12 = scmp.lt.s32.totalorder %s2039_s9, %s2032_s26 }
  0x74   : > { %p2036_p3 = pneg %p2035_p13  ;;  %p2042_p11 = por %p2041_p12, %p2040_p7 }
  0x76   : > { %p2043_p1 = pnand %p2042_p11, %p2036_p3 }
  0x78   : > { %2046 = shalt.err (!%p2043_p1)
}
  0x79   : > { %s3597_s11 = smov 8   ;;  %s3598_s13 = smov 128  }
  0x7a   : > { %1871 = dma.hbm_to_vmem [thread:$0]  (!%p2422_p0), %s2416_s12, 2048, %s2411_s29, %s2426_s18, %s3598_s13, %s3598_s13, %s3597_s11  }
  0x7b   : > { %p3599_p5 = scmp.ne.s32.totalorder %s3587_s7, 0 }
  0x7c   : > { %s2460_s6 = sand.u32 (!%p3599_p5), 1, %s2178_s19   ;;  %p3600_p9 = scmp.ne.s32.totalorder (!%p3599_p5), %s3584_s30, 0 }
  0x7d   : > { %226 = sbr.rel (%p3599_p5) target bundleno = 640 (0x280), region = 36  ;;  %s1689_s3 = sshll.u32 (!%p3599_p5), %s2460_s6, 7 }
  0x7e   : > { %s229_s5 = scalar_lea.sflag (!%p3599_p5), [#allocation4], %s2460_s6  ;;  %s2466_s10 = scalar_lea.vmem (!%p3599_p5), [#allocation3], %s1689_s3 }
  0x84   : > { %2157 = dma.done.wait (%p3600_p9), %s229_s5, 2048  }
  0x85   : > { %2159 = vsyncadd (%p3600_p9), %s229_s5, 4294965248  ;;  %p3601_p0 = scmp.ne.s32.totalorder %s3582_s28, 0 }
  0x87   : > { %2161 = dma.done.wait (%p3601_p0), [#allocation7], 2240  }
  0x88   : > { %2163 = vsyncadd (%p3601_p0), [#allocation7], 4294965056  ;;  %s3563_s7 = sshll.u32 %s2186_s21, 3  ;;  %v2211_v0 = vmov 0.0   ;;  %v289_v1 = vld [vmem:[%s2466_s10] sm:$0xff]  ;;  %v290_v2 = vld [vmem:[%s2466_s10 + $0x8] sm:$0xff] }
  0x89   : > { %s2479_s12 = sadd.s32 4294967295, %s3563_s7  ;;  %269 = vst [vmem:[#allocation2] sm:$0x1] %v2211_v0  ;;  %270 = vst [vmem:[#allocation2 + $0x18] sm:$0x1] %v2211_v0  ;;  %v291_v3 = vld [vmem:[%s2466_s10 + $0x10] sm:$0xff] }
  0x8a   : > { %271 = vst [vmem:[#allocation2 + $0x30] sm:$0x1] %v2211_v0  ;;  %272 = vst [vmem:[#allocation2 + $0x48] sm:$0x1] %v2211_v0  ;;  %p322_p2 = scmp.ge.s32.totalorder %s2479_s12, 0  ;;  %p323_p10 = scmp.lt.s32.totalorder %s2479_s12, 16 }
  0x8b   : > { %273 = vst [vmem:[#allocation2 + $0x60] sm:$0x1] %v2211_v0  ;;  %274 = vst [vmem:[#allocation2 + $0x78] sm:$0x1] %v2211_v0  ;;  %v292_v4 = vld [vmem:[%s2466_s10 + $0x18] sm:$0xff]  ;;  %v293_v5 = vld [vmem:[%s2466_s10 + $0x20] sm:$0xff] }
  0x8c   : > { %275 = vst [vmem:[#allocation2 + $0x90] sm:$0x1] %v2211_v0  ;;  %276 = vst [vmem:[#allocation2 + $0xa8] sm:$0x1] %v2211_v0  ;;  %p2483_p4 = pnand %p323_p10, %p322_p2  ;;  %v294_v6 = vld [vmem:[%s2466_s10 + $0x28] sm:$0xff]  ;;  %v295_v7 = vld [vmem:[%s2466_s10 + $0x30] sm:$0xff] }
  0x8d   : > { %277 = vst [vmem:[#allocation2 + $0xc0] sm:$0x1] %v2211_v0  ;;  %278 = vst [vmem:[#allocation2 + $0xd8] sm:$0x1] %v2211_v0  ;;  %v296_v8 = vld [vmem:[%s2466_s10 + $0x38] sm:$0xff]  ;;  %v297_v9 = vld [vmem:[%s2466_s10 + $0x40] sm:$0xff] }
  0x8e   : > { %279 = vst [vmem:[#allocation2 + $0x11] sm:$0x1] %v2211_v0  ;;  %280 = vst [vmem:[#allocation2 + $0x29] sm:$0x1] %v2211_v0  ;;  %v298_v10 = vld [vmem:[%s2466_s10 + $0x48] sm:$0xff]  ;;  %v299_v11 = vld [vmem:[%s2466_s10 + $0x50] sm:$0xff] }
  0x8f   : > { %281 = vst [vmem:[#allocation2 + $0x41] sm:$0x1] %v2211_v0  ;;  %282 = vst [vmem:[#allocation2 + $0x59] sm:$0x1] %v2211_v0  ;;  %v300_v12 = vld [vmem:[%s2466_s10 + $0x58] sm:$0xff]  ;;  %v301_v13 = vld [vmem:[%s2466_s10 + $0x60] sm:$0xff] }
  0x90   : > { %283 = vst [vmem:[#allocation2 + $0x71] sm:$0x1] %v2211_v0  ;;  %284 = vst [vmem:[#allocation2 + $0x89] sm:$0x1] %v2211_v0  ;;  %v302_v14 = vld [vmem:[%s2466_s10 + $0x68] sm:$0xff]  ;;  %v303_v15 = vld [vmem:[%s2466_s10 + $0x70] sm:$0xff] }
  0x91   : > { %285 = vst [vmem:[#allocation2 + $0xa1] sm:$0x1] %v2211_v0  ;;  %286 = vst [vmem:[#allocation2 + $0xb9] sm:$0x1] %v2211_v0  ;;  %v304_v16 = vld [vmem:[%s2466_s10 + $0x78] sm:$0xff]  ;;  %s2505_s30 = scalar_lea.vmem [#allocation9], %s1689_s3 }
  0x92   : > { %287 = vst [vmem:[#allocation2 + $0xd1] sm:$0x1] %v2211_v0  ;;  %288 = vst [vmem:[#allocation2 + $0xe9] sm:$0x1] %v2211_v0 }
  0x93   : > { %306 = vst [vmem:[#allocation2 + $0x19] sm:$0xff] %v289_v1  ;;  %307 = vst [vmem:[#allocation2 + $0x21] sm:$0xff] %v290_v2 }
  0x94   : > { %308 = vst [vmem:[#allocation2 + $0x31] sm:$0xff] %v291_v3  ;;  %309 = vst [vmem:[#allocation2 + $0x39] sm:$0xff] %v292_v4  ;;  %327 = sbr.rel (%p2483_p4) target bundleno = 182 (0xb6), region = 52 }
  0x95   : > { %310 = vst [vmem:[#allocation2 + $0x49] sm:$0xff] %v293_v5  ;;  %311 = vst [vmem:[#allocation2 + $0x51] sm:$0xff] %v294_v6 }
  0x96   : > { %312 = vst [vmem:[#allocation2 + $0x61] sm:$0xff] %v295_v7  ;;  %313 = vst [vmem:[#allocation2 + $0x69] sm:$0xff] %v296_v8 }
  0x97   : > { %314 = vst [vmem:[#allocation2 + $0x79] sm:$0xff] %v297_v9  ;;  %315 = vst [vmem:[#allocation2 + $0x81] sm:$0xff] %v298_v10 }
  0x98   : > { %316 = vst [vmem:[#allocation2 + $0x91] sm:$0xff] %v299_v11  ;;  %317 = vst [vmem:[#allocation2 + $0x99] sm:$0xff] %v300_v12 }
  0x99   : > { %318 = vst [vmem:[#allocation2 + $0xa9] sm:$0xff] %v301_v13  ;;  %319 = vst [vmem:[#allocation2 + $0xb1] sm:$0xff] %v302_v14 }
  0x9a   : > { %320 = vst [vmem:[#allocation2 + $0xc1] sm:$0xff] %v303_v15  ;;  %321 = vst [vmem:[#allocation2 + $0xc9] sm:$0xff] %v304_v16 }
  0x9b   : > { %s1695_s29 = sshll.u32 %s2479_s12, 4  ;;  %s1696_s18 = sshll.u32 %s2190_s22, 8 }
  0x9c   : > { %s330_s14 = sadd.s32 %s1696_s18, %s1695_s29  ;;  %s2212_s17 = smov [#allocation2 + $0x1]  }
  0x9d   : > { %s1697_s16 = sshll.u32 %s330_s14, 4  ;;  %s341_s26 = sshll.u32 %s2212_s17, 4  ;;  %s342_s26 = int_to_ptr.vmem [resolvable:$true] %s341_s26 }
  0x9e   : > { %s332_s9 = scalar_lea.hbm %s3546_s1, %s1697_s16  ;;  %s2049_s5 = scalar_lea.hbm %s3546_s1, 8192 }
  0x9f   : > { %s2047_s11 = scalar_lea.hbm %s332_s9, 256  ;;  %p2050_p13 = scmp.lt.u32.totalorder %s332_s9, %s3546_s1 }
  0xa0   : > { %p2048_p8 = scmp.ne.s32.totalorder %s332_s9, %s2047_s11  ;;  %p2051_p3 = scmp.lt.u32.totalorder %s2049_s5, %s2047_s11 }
  0xa1   : > { %p2053_p12 = scmp.lt.u32.totalorder %s2047_s11, %s332_s9 }
  0xa2   : > { %p2052_p7 = por %p2051_p3, %p2050_p13 }
  0xa4   : > { %p2054_p11 = por %p2053_p12, %p2052_p7 }
  0xa6   : > { %p2055_p1 = pnand %p2054_p11, %p2048_p8 }
  0xa8   : > { %2058 = shalt.err (!%p2055_p1)  }
  0xa9   : > { %s2059_s12 = scalar_lea.vmem %s342_s26, 256  ;;  %s2213_s29 = smov [#allocation2]  }
  0xaa   : > { %p2060_p5 = scmp.ne.s32.totalorder %s342_s26, %s2059_s12  ;;  %s2061_s18 = sshll.u32 %s2213_s29, 4  ;;  %s2062_s18 = int_to_ptr.vmem [resolvable:$false] %s2061_s18 }
  0xab   : > { %s2063_s14 = scalar_lea.vmem %s2062_s18, 3840  ;;  %p2064_p9 = scmp.lt.s32.totalorder %s342_s26, %s2062_s18 }
  0xac   : > { %p2065_p0 = scmp.lt.s32.totalorder %s2063_s14, %s2059_s12 }
  0xae   : > { %p2066_p2 = por %p2065_p0, %p2064_p9 }
  0xb0   : > { %p2067_p10 = pnand %p2066_p2, %p2060_p5 }
  0xb2   : > { %2070 = shalt.err (!%p2067_p10)  }
  0xb3   : > { %344 = dma.hbm_to_vmem [thread:$0]  %s332_s9, 256, %s342_s26, [#allocation10] }
  0xb4   : > { %2164 = dma.done.wait [#allocation10], 256 }
  0xb5   : > { %2165 = vsyncadd [#allocation10], 4294967040 }
  0xb6 PF: > { %351 = sbr.rel (!%p2483_p4) target bundleno = 189 (0xbd), region = 61  ;;  %v2214_v17 = vmov (%p2483_p4), 0.0  }
  0xb7   : > { %352 = vst [vmem:[#allocation2 + $0x1] sm:$0xff] (%p2483_p4), %v2214_v17  ;;  %353 = vst [vmem:[#allocation2 + $0x9] sm:$0xff] (%p2483_p4), %v2214_v17 }
  0xbd PF: > { %s3603_s7 = sshll.u32 %s2186_s21, 3 }
  0xbe   : > { %s354_s16 = sadd.s32 8, %s3603_s7 }
  0xbf   : > { %p355_p8 = scmp.ge.s32.totalorder %s354_s16, 0  ;;  %p356_p13 = scmp.lt.s32.totalorder %s354_s16, 16 }
  0xc1   : > { %p2524_p3 = pnand %p356_p13, %p355_p8 }
  0xc3   : > { %360 = sbr.rel (%p2524_p3) target bundleno = 230 (0xe6), region = 65 }
  0xca   : > { %s1711_s28 = sshll.u32 %s2186_s21, 7  ;;  %s1700_s26 = sshll.u32 %s2190_s22, 8 }
  0xcb   : > { %s1609_s27 = sadd.s32 %s1711_s28, %s1700_s26  ;;  %s2215_s9 = smov [#allocation2 + $0xd9]  }
  0xcc   : > { %s1701_s8 = sshll.u32 %s1609_s27, 4  ;;  %s374_s11 = sshll.u32 %s2215_s9, 4  ;;  %s375_s11 = int_to_ptr.vmem [resolvable:$true] %s374_s11 }
  0xcd   : > { %s1611_s5 = scalar_lea.hbm %s3546_s1, %s1701_s8  ;;  %s2073_s14 = scalar_lea.hbm %s3546_s1, 8192 }
  0xce   : > { %s1612_s10 = scalar_lea.hbm %s1611_s5, 2048  ;;  %s2095_s12 = scalar_lea.hbm %s1611_s5, 2304 }
  0xcf   : > { %p2072_p4 = scmp.ne.s32.totalorder %s1612_s10, %s2095_s12  ;;  %p2074_p7 = scmp.lt.u32.totalorder %s1612_s10, %s3546_s1 }
  0xd0   : > { %p2075_p12 = scmp.lt.u32.totalorder %s2073_s14, %s2095_s12  ;;  %p2077_p1 = scmp.lt.u32.totalorder %s2095_s12, %s1612_s10 }
  0xd2   : > { %p2076_p11 = por %p2075_p12, %p2074_p7 }
  0xd4   : > { %p2078_p5 = por %p2077_p1, %p2076_p11 }
  0xd6   : > { %p2079_p9 = pnand %p2078_p5, %p2072_p4 }
  0xd8   : > { %2082 = shalt.err (!%p2079_p9)  }
  0xd9   : > { %s2083_s28 = scalar_lea.vmem %s375_s11, 256  ;;  %s2216_s26 = smov [#allocation2]  }
  0xda   : > { %p2084_p0 = scmp.ne.s32.totalorder %s375_s11, %s2083_s28  ;;  %s2085_s27 = sshll.u32 %s2216_s26, 4  ;;  %s2086_s27 = int_to_ptr.vmem [resolvable:$false] %s2085_s27 }
  0xdb   : > { %s2087_s8 = scalar_lea.vmem %s2086_s27, 3840  ;;  %p2088_p2 = scmp.lt.s32.totalorder %s375_s11, %s2086_s27 }
  0xdc   : > { %p2089_p10 = scmp.lt.s32.totalorder %s2087_s8, %s2083_s28 }
  0xde   : > { %p2090_p8 = por %p2089_p10, %p2088_p2 }
  0xe0   : > { %p2091_p13 = pnand %p2090_p8, %p2084_p0 }
  0xe2   : > { %2094 = shalt.err (!%p2091_p13)  }
  0xe3   : > { %377 = dma.hbm_to_vmem [thread:$0]  %s1612_s10, 256, %s375_s11, [#allocation15] }
  0xe4   : > { %2166 = dma.done.wait [#allocation15], 256 }
  0xe5   : > { %2167 = vsyncadd [#allocation15], 4294967040 }
  0xe6 PF: > { %384 = sbr.rel (!%p2524_p3) target bundleno = 237 (0xed), region = 74  ;;  %v2217_v18 = vmov (%p2524_p3), 0.0  }
  0xe7   : > { %386 = vst [vmem:[#allocation2 + $0xd9] sm:$0xff] (%p2524_p3), %v2217_v18  ;;  %387 = vst [vmem:[#allocation2 + $0xe1] sm:$0xff] (%p2524_p3), %v2217_v18 }
  0xed PF: > { %v1275_v19 = vld [vmem:[#allocation8] sm:$0xff]  ;;  %v1276_v20 = vld [vmem:[#allocation8 + $0x8] sm:$0xff]  ;;  %v1277_v21 = vld [vmem:[#allocation8 + $0x10] sm:$0xff]  ;;  %v421_v22 = vlaneseq  ;;  %vm509_vm0 = vcmask 1046528   ;;  %vm634_vm1 = vcmask 1045504   ;;  %s1712_s11 = sshll.u32 %s2186_s21, 4 }
  0xee   : > { %v1801_v23 = vpack.c.bf16 %v1276_v20, %v1275_v19  ;;  %v1278_v24 = vld [vmem:[#allocation8 + $0x18] sm:$0xff]  ;;  %v1279_v25 = vld [vmem:[#allocation8 + $0x20] sm:$0xff]  ;;  %v1280_v26 = vld [vmem:[#allocation8 + $0x28] sm:$0xff]  ;;  %s1706_s13 = sshll.u32 %s2190_s22, 5  ;;  %s1556_s10 = sshll.u32 %s2505_s30, 4  ;;  %s3489_s10 = int_to_ptr.vmem [resolvable:$true] %s1556_s10 }
  0xef   : > { %v1805_v27 = vpack.c.bf16 %v1278_v24, %v1277_v21  ;;  %v1281_v28 = vld [vmem:[#allocation8 + $0x30] sm:$0xff]  ;;  %v1282_v29 = vld [vmem:[#allocation8 + $0x38] sm:$0xff]  ;;  %v1283_v30 = vld [vmem:[#allocation8 + $0x40] sm:$0xff]  ;;  %v422_v31 = vshrl.u32 %v421_v22, 7  ;;  %v1809_v40 = vpack.c.bf16 %v1280_v26, %v1279_v25  ;;  %s1553_s3 = sadd.s32 %s1712_s11, %s1706_s13  ;;  %s3620_s29 = sld [smem:[#allocation29_spill]] }
  0xf0   : > { %1802 = vmatprep.subr.bf16.mxu0 %v1801_v23  ;;  %1833 = vmatprep.subr.bf16.mxu1 %v1801_v23  ;;  %v1284_v32 = vld [vmem:[#allocation8 + $0x48] sm:$0xff]  ;;  %v1285_v33 = vld [vmem:[#allocation8 + $0x50] sm:$0xff]  ;;  %v1286_v34 = vld [vmem:[#allocation8 + $0x58] sm:$0xff]  ;;  %v1813_v43 = vpack.c.bf16 %v1282_v29, %v1281_v28  ;;  %s1707_s21 = sshll.u32 %s1553_s3, 7  ;;  %s1540_s14 = scalar_lea.sflag [#allocation5], %s2460_s6 }
  0xf1   : > { %1804 = vmatpush3.bf16.msra.mxu0 %v1801_v23  ;;  %1841 = vmatpush3.bf16.msra.mxu1 %v1801_v23  ;;  %v1287_v35 = vld [vmem:[#allocation8 + $0x60] sm:$0xff]  ;;  %v1288_v36 = vld [vmem:[#allocation8 + $0x68] sm:$0xff]  ;;  %v1289_v37 = vld [vmem:[#allocation8 + $0x70] sm:$0xff]  ;;  %v423_v38 = vsub.s32 0, %v422_v31  ;;  %v459_v39 = vsub.s32 1, %v422_v31  ;;  %v2543_v42 = vsub.s32 2, %v422_v31  ;;  %v2545_v45 = vpack.c.bf16 %v1284_v32, %v1283_v30 }
  0xf2   : > { %1806 = vmatprep.subr.bf16.mxu0 %v1805_v27  ;;  %1834 = vmatprep.subr.bf16.mxu1 %v1805_v27  ;;  %v1290_v41 = vld [vmem:[#allocation8 + $0x78] sm:$0xff]  ;;  %v388_v44 = vld [vmem:[#allocation2] sm:$0xff]  ;;  %v2547_v46 = vpack.c.bf16 %v1286_v34, %v1285_v33  ;;  %v2549_v47 = vpack.c.bf16 %v1288_v36, %v1287_v35  ;;  %v2553_v49 = vld [vmem:[#allocation2 + $0x8] sm:$0xff]  ;;  %s2096_s7 = scalar_lea.vmem %s3489_s10, 2048  ;;  %s2218_s16 = smov [#allocation9]  }
  0xf3   : > { %v2551_v48 = vpack.c.bf16 %v1290_v41, %v1289_v37  ;;  %v418_v50 = vld [vmem:[#allocation6] sm:$0x7]  ;;  %v419_v51 = vld [vmem:[#allocation6 + $0x4] sm:$0x7]  ;;  %v2569_v58 = vld [vmem:[#allocation2 + $0x18] sm:$0xff]  ;;  %p2097_p3 = scmp.ne.s32.totalorder %s3489_s10, %s2096_s7  ;;  %s2100_s28 = sshll.u32 %s2218_s16, 4  ;;  %s2101_s28 = int_to_ptr.vmem [resolvable:$false] %s2100_s28 }
  0xf4   : > { %v2555_v52 = vrot.slane %v418_v50, %v423_v38  ;;  %v2557_v53 = vrot.slane %v418_v50, %v459_v39  ;;  %v2560_v54 = vrot.slane %v418_v50, %v2543_v42  ;;  %v2562_v55 = vrot.slane %v419_v51, %v423_v38  ;;  %v2571_v59 = vld [vmem:[#allocation2 + $0x20] sm:$0xff]  ;;  %v420_v0 = vld [vmem:[#allocation6 + $0x8] sm:$0x7]  ;;  %v2608_v17 = vld [vmem:[#allocation2 + $0x30] sm:$0xff]  ;;  %s2102_s26 = scalar_lea.vmem %s2101_s28, 4096  ;;  %p2103_p12 = scmp.lt.s32.totalorder %s3489_s10, %s2101_s28 }
  0xf5   : > { %1808 = vmatpush3.bf16.msra.mxu0 %v1805_v27  ;;  %1842 = vmatpush3.bf16.msra.mxu1 %v1805_v27  ;;  %v2564_v56 = vrot.slane %v419_v51, %v459_v39  ;;  %v2567_v57 = vrot.slane %v419_v51, %v2543_v42  ;;  %v2604_v15 = vrot.slane %v420_v0, %v423_v38  ;;  %v2610_v18 = vld [vmem:[#allocation2 + $0x38] sm:$0xff]  ;;  %v2619_v23 = vld [vmem:[#allocation2 + $0x60] sm:$0xff]  ;;  %v2629_v27 = vld [vmem:[#allocation2 + $0x68] sm:$0xff]  ;;  %s3487_s18 = scalar_lea.hbm %s3620_s29, %s1707_s21  ;;  %p2098_p4 = pnand %p2097_p3, %p2396_p6 }
  0xf6   : > { %1810 = vmatprep.subr.bf16.mxu0 %v1809_v40  ;;  %1835 = vmatprep.subr.bf16.mxu1 %v1809_v40  ;;  %v425_v60 = vmul.f32 %v2555_v52, %v388_v44  ;;  %v461_v61 = vmul.f32 %v2557_v53, %v388_v44  ;;  %v2577_v62 = vmul.f32 %v2557_v53, %v2553_v49  ;;  %v2668_v50 = vld [vmem:[#allocation2 + $0x78] sm:$0xff]  ;;  %p2104_p11 = scmp.lt.s32.totalorder %s2102_s26, %s2096_s7 }
  0xf7   : > { %v586_v63 = vmul.f32 %v2560_v54, %v388_v44  ;;  %v2582_v1 = vmul.f32 %v2560_v54, %v2553_v49  ;;  %v711_v2 = vmul.f32 %v2562_v55, %v2569_v58  ;;  %v747_v3 = vmul.f32 %v2564_v56, %v2569_v58  ;;  %p2099_p7 = pneg %p2098_p4 }
  0xf8   : > { %v2590_v4 = vmul.f32 %v2564_v56, %v2571_v59  ;;  %v510_v5 = vrot.slane %v461_v61, 1  ;;  %v511_v6 = vrot.slane %v2577_v62, 1  ;;  %v871_v8 = vmul.f32 %v2567_v57, %v2569_v58  ;;  %p2105_p1 = por %p2104_p11, %p2103_p12 }
  0xf9   : > { %1812 = vmatpush3.bf16.msra.mxu0 %v1809_v40  ;;  %1843 = vmatpush3.bf16.msra.mxu1 %v1809_v40  ;;  %v635_v7 = vrot.slane %v586_v63, 2  ;;  %v636_v9 = vrot.slane %v2582_v1, 2  ;;  %v795_v10 = vrot.slane %v747_v3, 1  ;;  %v2599_v12 = vmul.f32 %v2567_v57, %v2571_v59 }
  0xfa   : > { %1814 = vmatprep.subr.bf16.mxu0 %v1813_v43  ;;  %1836 = vmatprep.subr.bf16.mxu1 %v1813_v43  ;;  %v796_v11 = vrot.slane %v2590_v4, 1  ;;  %v512_v13 = vsel %vm509_vm0, %v510_v5, %v511_v6  ;;  %v919_v14 = vrot.slane %v871_v8, 2  ;;  %v2606_v16 = vrot.slane %v420_v0, %v459_v39  ;;  %p2106_p5 = pnand %p2105_p1, %p2099_p7 }
  0xfb   : > { %v566_v19 = vadd.f32 %v512_v13, %v425_v60  ;;  %v637_v20 = vsel %vm634_vm1, %v635_v7, %v636_v9  ;;  %v920_v22 = vrot.slane %v2599_v12, 2  ;;  %v995_v24 = vmul.f32 %v2604_v15, %v2608_v17  ;;  %v2671_v60 = vld [vmem:[#allocation2 + $0x80] sm:$0xff] }
  0xfc   : > { %v797_v21 = vsel %vm509_vm0, %v795_v10, %v796_v11  ;;  %v1031_v25 = vmul.f32 %v2606_v16, %v2608_v17  ;;  %v2627_v26 = vmul.f32 %v2606_v16, %v2610_v18  ;;  %v2637_v30 = vrot.slane %v420_v0, %v2543_v42  ;;  %v2690_v10 = vld [vmem:[#allocation2 + $0x90] sm:$0xff] }
  0xfd   : > { %1816 = vmatpush3.bf16.msra.mxu0 %v1813_v43  ;;  %1844 = vmatpush3.bf16.msra.mxu1 %v1813_v43  ;;  %v691_v28 = vadd.f32 %v637_v20, %v566_v19  ;;  %v921_v29 = vsel %vm634_vm1, %v919_v14, %v920_v22  ;;  %v433_v33 = vmul.f32 %v2555_v52, %v2619_v23 }
  0xfe   : > { %1818 = vmatprep.subr.bf16.mxu0 %v2545_v45  ;;  %1837 = vmatprep.subr.bf16.mxu1 %v2545_v45  ;;  %v1079_v31 = vrot.slane %v1031_v25, 1  ;;  %v1080_v32 = vrot.slane %v2627_v26, 1  ;;  %v473_v34 = vmul.f32 %v2557_v53, %v2619_v23  ;;  %v1155_v36 = vmul.f32 %v2637_v30, %v2608_v17  ;;  %v2699_v25 = vld [vmem:[#allocation2 + $0x98] sm:$0xff] }
  0xff   : > { %v727_v35 = vadd.f32 %v711_v2, %v691_v28  ;;  %v2648_v37 = vmul.f32 %v2637_v30, %v2610_v18  ;;  %v2652_v38 = vmul.f32 %v2557_v53, %v2629_v27  ;;  %v598_v41 = vmul.f32 %v2560_v54, %v2619_v23 }
 0x100   : > { %v1081_v39 = vsel %vm509_vm0, %v1079_v31, %v1080_v32  ;;  %v530_v40 = vrot.slane %v473_v34, 1  ;;  %v2663_v42 = vmul.f32 %v2560_v54, %v2629_v27  ;;  %v1203_v44 = vrot.slane %v1155_v36, 2 }
 0x101   : > { %1820 = vmatpush3.bf16.msra.mxu0 %v2545_v45  ;;  %1845 = vmatpush3.bf16.msra.mxu1 %v2545_v45  ;;  %v851_v43 = vadd.f32 %v797_v21, %v727_v35  ;;  %v1204_v45 = vrot.slane %v2648_v37, 2  ;;  %v531_v51 = vrot.slane %v2652_v38, 1  ;;  %v655_v61 = vrot.slane %v598_v41, 2 }
 0x102   : > { %1822 = vmatprep.subr.bf16.mxu0 %v2547_v46  ;;  %1838 = vmatprep.subr.bf16.mxu1 %v2547_v46  ;;  %v656_v63 = vrot.slane %v2663_v42, 2  ;;  %v719_v0 = vmul.f32 %v2562_v55, %v2668_v50  ;;  %v759_v2 = vmul.f32 %v2564_v56, %v2668_v50  ;;  %v2686_v8 = vmul.f32 %v2564_v56, %v2671_v60 }
 0x103   : > { %v975_v3 = vadd.f32 %v921_v29, %v851_v43  ;;  %v1205_v5 = vsel %vm634_vm1, %v1203_v44, %v1204_v45  ;;  %v532_v7 = vsel %vm509_vm0, %v530_v40, %v531_v51  ;;  %v883_v20 = vmul.f32 %v2567_v57, %v2668_v50  ;;  %v390_v43 = vld [vmem:[#allocation2 + $0x10] sm:$0x3] }
 0x104   : > { %v574_v13 = vadd.f32 %v532_v7, %v433_v33  ;;  %v657_v14 = vsel %vm634_vm1, %v655_v61, %v656_v63  ;;  %v815_v19 = vrot.slane %v759_v2, 1  ;;  %v2704_v28 = vmul.f32 %v2567_v57, %v2671_v60 }
 0x105   : > { %1824 = vmatpush3.bf16.msra.mxu0 %v2547_v46  ;;  %1846 = vmatpush3.bf16.msra.mxu1 %v2547_v46  ;;  %v1011_v21 = vadd.f32 %v995_v24, %v975_v3  ;;  %v816_v46 = vrot.slane %v2686_v8, 1  ;;  %v1003_v29 = vmul.f32 %v2604_v15, %v2690_v10  ;;  %v939_v33 = vrot.slane %v883_v20, 2  ;;  %v2738_v20 = vld [vmem:[#allocation2 + $0x28] sm:$0x3] }
 0x106   : > { %1826 = vmatprep.subr.bf16.mxu0 %v2549_v47  ;;  %1839 = vmatprep.subr.bf16.mxu1 %v2549_v47  ;;  %v699_v31 = vadd.f32 %v657_v14, %v574_v13  ;;  %v1043_v34 = vmul.f32 %v2606_v16, %v2690_v10  ;;  %v2712_v35 = vmul.f32 %v2606_v16, %v2699_v25  ;;  %v3565_v40 = vrot.slane %v2704_v28, 2 }
 0x107   : > { %v1135_v24 = vadd.f32 %v1081_v39, %v1011_v21  ;;  %v817_v36 = vsel %vm509_vm0, %v815_v19, %v816_v46  ;;  %v1167_v41 = vmul.f32 %v2637_v30, %v2690_v10  ;;  %v2725_v39 = vmul.f32 %v2637_v30, %v2699_v25 }
 0x108   : > { %v735_v44 = vadd.f32 %v719_v0, %v699_v31  ;;  %v1099_v61 = vrot.slane %v1043_v34, 1  ;;  %v3564_v2 = vrot.slane %v2712_v35, 1  ;;  %v941_v7 = vsel %vm634_vm1, %v939_v33, %v3565_v40  ;;  %v2759_v40 = vld [vmem:[#allocation2 + $0x70] sm:$0x3] }
 0x109   : > { %1828 = vmatpush3.bf16.msra.mxu0 %v2549_v47  ;;  %1847 = vmatpush3.bf16.msra.mxu1 %v2549_v47  ;;  %v1259_v3 = vadd.f32 %v1205_v5, %v1135_v24  ;;  %v1223_v13 = vrot.slane %v1167_v41, 2  ;;  %v426_v47 = vmul.f32 %v2555_v52, %v2553_v49  ;;  %v1224_v19 = vrot.slane %v2725_v39, 2 }
 0x10a   : > { %1830 = vmatprep.subr.bf16.mxu0 %v2551_v48  ;;  %1840 = vmatprep.subr.bf16.mxu1 %v2551_v48  ;;  %v859_v0 = vadd.f32 %v817_v36, %v735_v44  ;;  %v1101_v14 = vsel %vm509_vm0, %v1099_v61, %v3564_v2  ;;  %v463_v21 = vmul.f32 %v2557_v53, %v390_v43  ;;  %v2753_v36 = vld [vmem:[#allocation2 + $0x40] sm:$0x3] }
 0x10b   : > { %1777 = vmatprep.mubr.f32.mxu0 %v1259_v3  ;;  %v588_v5 = vmul.f32 %v2560_v54, %v390_v43  ;;  %v712_v31 = vmul.f32 %v2562_v55, %v2571_v59  ;;  %v749_v49 = vmul.f32 %v2564_v56, %v2738_v20  ;;  %v873_v33 = vmul.f32 %v2567_v57, %v2738_v20 }
 0x10c   : > { %v983_v34 = vadd.f32 %v941_v7, %v859_v0  ;;  %v1225_v24 = vsel %vm634_vm1, %v1223_v13, %v1224_v19  ;;  %v513_v41 = vrot.slane %v463_v21, 1  ;;  %v996_v43 = vmul.f32 %v2604_v15, %v2610_v18 }
 0x10d   : > { %1832 = vmatpush3.bf16.msra.mxu0 %v2551_v48  ;;  %1848 = vmatpush3.bf16.msra.mxu1 %v2551_v48  ;;  %v638_v44 = vrot.slane %v588_v5, 2  ;;  %v798_v61 = vrot.slane %v749_v49, 1  ;;  %v922_v3 = vrot.slane %v873_v33, 2  ;;  %v1033_v2 = vmul.f32 %v2606_v16, %v2753_v36 }
 0x10e   : > { %v1019_v48 = vadd.f32 %v1003_v29, %v983_v34  ;;  %v514_v7 = vsel %vm509_vm0, %v511_v6, %v513_v41  ;;  %v1157_v13 = vmul.f32 %v2637_v30, %v2753_v36  ;;  %v434_v0 = vmul.f32 %v2555_v52, %v2629_v27  ;;  %v2777_v34 = vld [vmem:[#allocation2 + $0x88] sm:$0x3] }
 0x10f   : > { %v567_v21 = vadd.f32 %v514_v7, %v426_v47  ;;  %v639_v5 = vsel %vm634_vm1, %v636_v9, %v638_v44  ;;  %v799_v49 = vsel %vm509_vm0, %v796_v11, %v798_v61  ;;  %v923_v62 = vsel %vm634_vm1, %v920_v22, %v922_v3  ;;  %v2793_v44 = vld [vmem:[#allocation2 + $0xa0] sm:$0x3] }
 0x110   : > { %v1143_v6 = vadd.f32 %v1101_v14, %v1019_v48  ;;  %v1082_v29 = vrot.slane %v1033_v2, 1  ;;  %v1206_v33 = vrot.slane %v1157_v13, 2  ;;  %v475_v47 = vmul.f32 %v2557_v53, %v2759_v40 }
 0x111   : > { %v692_v41 = vadd.f32 %v639_v5, %v567_v21  ;;  %v600_v1 = vmul.f32 %v2560_v54, %v2759_v40  ;;  %v720_v4 = vmul.f32 %v2562_v55, %v2671_v60  ;;  %v761_v9 = vmul.f32 %v2564_v56, %v2777_v34 }
 0x112   : > { %v1267_v11 = vadd.f32 %v1225_v24, %v1143_v6  ;;  %v1083_v12 = vsel %vm509_vm0, %v1080_v32, %v1082_v29  ;;  %v1207_v22 = vsel %vm634_vm1, %v1204_v45, %v1206_v33  ;;  %v533_v2 = vrot.slane %v475_v47, 1 }
 0x113   : > { %v728_v14 = vadd.f32 %v712_v31, %v692_v41  ;;  %v658_v61 = vrot.slane %v600_v1, 2  ;;  %v818_v3 = vrot.slane %v761_v9, 1  ;;  %v885_v48 = vmul.f32 %v2567_v57, %v2777_v34 }
 0x114   : > { %1789 = vmatprep.mubr.f32.mxu1 %v1267_v11  ;;  %v534_v26 = vsel %vm509_vm0, %v531_v51, %v533_v2  ;;  %v1004_v32 = vmul.f32 %v2604_v15, %v2699_v25  ;;  %v1045_v37 = vmul.f32 %v2606_v16, %v2793_v44  ;;  %v1169_v45 = vmul.f32 %v2637_v30, %v2793_v44 }
 0x115   : > { %v852_v31 = vadd.f32 %v799_v49, %v728_v14  ;;  %v575_v24 = vadd.f32 %v534_v26, %v434_v0  ;;  %v659_v7 = vsel %vm634_vm1, %v656_v63, %v658_v61  ;;  %v819_v38 = vsel %vm509_vm0, %v816_v46, %v818_v3 }
 0x116   : > { %v942_v51 = vrot.slane %v885_v48, 2  ;;  %v1102_v13 = vrot.slane %v1045_v37, 1  ;;  %v1226_v21 = vrot.slane %v1169_v45, 2  ;;  %v427_v5 = vmul.f32 %v2555_v52, %v2569_v58  ;;  %v2850_v37 = vld [vmem:[#allocation2 + $0x48] sm:$0xff] }
 0x117   : > { %v976_v6 = vadd.f32 %v923_v62, %v852_v31  ;;  %v700_v29 = vadd.f32 %v659_v7, %v575_v24  ;;  %v464_v49 = vmul.f32 %v2557_v53, %v2569_v58  ;;  %v2818_v42 = vmul.f32 %v2557_v53, %v2571_v59 }
 0x118   : > { %v3605_v63 = vrot.slane %v2704_v28, 2  ;;  %v3606_v46 = vrot.slane %v2712_v35, 1  ;;  %v1227_v62 = vsel %vm634_vm1, %v1224_v19, %v1226_v21  ;;  %v589_v33 = vmul.f32 %v2560_v54, %v2569_v58 }
 0x119   : > { %v1012_v47 = vadd.f32 %v996_v43, %v976_v6  ;;  %v736_v41 = vadd.f32 %v720_v4, %v700_v29  ;;  %v515_v1 = vrot.slane %v464_v49, 1  ;;  %v516_v9 = vrot.slane %v2818_v42, 1 }
 0x11a   : > { %v943_v8 = vsel %vm634_vm1, %v3605_v63, %v942_v51  ;;  %v1103_v0 = vsel %vm509_vm0, %v3606_v46, %v1102_v13  ;;  %v2834_v28 = vmul.f32 %v2560_v54, %v2571_v59  ;;  %v640_v11 = vrot.slane %v589_v33, 2  ;;  %v2864_v51 = vld [vmem:[#allocation2 + $0x50] sm:$0xff] }
 0x11b   : > { %v713_v35 = vmul.f32 %v2562_v55, %v2608_v17  ;;  %v750_v39 = vmul.f32 %v2564_v56, %v2608_v17  ;;  %v1136_v19 = vadd.f32 %v1083_v12, %v1012_v47  ;;  %v860_v2 = vadd.f32 %v819_v38, %v736_v41 }
 0x11c   : > { %v517_v58 = vsel %vm509_vm0, %v515_v1, %v516_v9  ;;  %v2845_v43 = vmul.f32 %v2564_v56, %v2610_v18  ;;  %v641_v14 = vrot.slane %v2834_v28, 2  ;;  %v874_v3 = vmul.f32 %v2567_v57, %v2608_v17 }
 0x11d   : > { %v568_v4 = vadd.f32 %v517_v58, %v427_v5  ;;  %v800_v61 = vrot.slane %v750_v39, 1  ;;  %v1260_v48 = vadd.f32 %v1207_v22, %v1136_v19  ;;  %v984_v26 = vadd.f32 %v943_v8, %v860_v2 }
 0x11e   : > { %v801_v12 = vrot.slane %v2845_v43, 1  ;;  %v2855_v45 = vmul.f32 %v2567_v57, %v2610_v18  ;;  %v642_v31 = vsel %vm634_vm1, %v640_v11, %v641_v14  ;;  %v924_v24 = vrot.slane %v874_v3, 2 }
 0x11f   : > { %v997_v7 = vmul.f32 %v2604_v15, %v2850_v37  ;;  %v1034_v22 = vmul.f32 %v2606_v16, %v2850_v37  ;;  %1778 = vmatmul.mubr.f32.vlgmr.msra.gmra.mrb[0].mxu0 %v1260_v48  ;;  %v1020_v38 = vadd.f32 %v1004_v32, %v984_v26  ;;  %v693_v13 = vadd.f32 %v642_v31, %v568_v4  ;;  %v2908_v31 = vld [vmem:[#allocation2 + $0xa8] sm:$0xff] }
 0x120   : > { %v802_v21 = vsel %vm509_vm0, %v800_v61, %v801_v12  ;;  %v925_v5 = vrot.slane %v2855_v45, 2  ;;  %v2872_v6 = vmul.f32 %v2606_v16, %v2864_v51  ;;  %v1158_v49 = vmul.f32 %v2637_v30, %v2850_v37 }
 0x121   : > { %v1084_v29 = vrot.slane %v1034_v22, 1  ;;  %v2878_v32 = vmul.f32 %v2637_v30, %v2864_v51  ;;  %v1144_v63 = vadd.f32 %v1103_v0, %v1020_v38  ;;  %v729_v8 = vadd.f32 %v713_v35, %v693_v13 }
 0x122   : > { %v926_v46 = vsel %vm634_vm1, %v924_v24, %v925_v5  ;;  %v435_v33 = vmul.f32 %v2555_v52, %v2668_v50  ;;  %v1085_v47 = vrot.slane %v2872_v6, 1  ;;  %v1208_v41 = vrot.slane %v1158_v49, 2 }
 0x123   : > { %v3571_v1 = vrot.slane %v2878_v32, 2  ;;  %v476_v11 = vmul.f32 %v2557_v53, %v2668_v50  ;;  %v1268_v39 = vadd.f32 %v1227_v62, %v1144_v63  ;;  %v853_v19 = vadd.f32 %v802_v21, %v729_v8 }
 0x124   : > { %v2891_v0 = vmul.f32 %v2557_v53, %v2671_v60  ;;  %v601_v35 = vmul.f32 %v2560_v54, %v2668_v50  ;;  %v1086_v2 = vsel %vm509_vm0, %v1084_v29, %v1085_v47  ;;  %v2903_v62 = vmul.f32 %v2560_v54, %v2671_v60 }
 0x125   : > { %v1210_v58 = vsel %vm634_vm1, %v1208_v41, %v3571_v1  ;;  %v535_v4 = vrot.slane %v476_v11, 1  ;;  %1790 = vmatmul.mubr.f32.vlgmr.msra.gmra.mrb[0].mxu1 %v1268_v39  ;;  %v977_v61 = vadd.f32 %v926_v46, %v853_v19  ;;  %v721_v26 = vmul.f32 %v2562_v55, %v2690_v10  ;;  %v2932_v39 = vld [vmem:[#allocation2 + $0xb0] sm:$0xff] }
 0x126   : > { %v3569_v3 = vrot.slane %v2891_v0, 1  ;;  %v660_v48 = vrot.slane %v601_v35, 2  ;;  %v3567_v24 = vrot.slane %v2903_v62, 2  ;;  %v762_v22 = vmul.f32 %v2564_v56, %v2690_v10 }
 0x127   : > { %v2915_v38 = vmul.f32 %v2564_v56, %v2699_v25  ;;  %v886_v13 = vmul.f32 %v2567_v57, %v2690_v10  ;;  %v1013_v21 = vadd.f32 %v997_v7, %v977_v61  ;;  %v2924_v49 = vmul.f32 %v2567_v57, %v2699_v25 }
 0x128   : > { %v537_v29 = vsel %vm509_vm0, %v535_v4, %v3569_v3  ;;  %v1005_v63 = vmul.f32 %v2604_v15, %v2908_v31  ;;  %v662_v46 = vsel %vm634_vm1, %v660_v48, %v3567_v24  ;;  %v820_v41 = vrot.slane %v762_v22, 1 }
 0x129   : > { %v576_v8 = vadd.f32 %v537_v29, %v435_v33  ;;  %v3566_v11 = vrot.slane %v2915_v38, 1  ;;  %v1137_v7 = vadd.f32 %v1086_v2, %v1013_v21  ;;  %v944_v19 = vrot.slane %v886_v13, 2 }
 0x12a   : > { %v3568_v35 = vrot.slane %v2924_v49, 2  ;;  %v1046_v4 = vmul.f32 %v2606_v16, %v2908_v31  ;;  %v2942_v48 = vmul.f32 %v2606_v16, %v2932_v39  ;;  %v1170_v2 = vmul.f32 %v2637_v30, %v2908_v31 }
 0x12b   : > { %v701_v61 = vadd.f32 %v662_v46, %v576_v8  ;;  %v822_v33 = vsel %vm509_vm0, %v820_v41, %v3566_v11  ;;  %v1261_v22 = vadd.f32 %v1210_v58, %v1137_v7  ;;  %v2951_v29 = vmul.f32 %v2637_v30, %v2932_v39 }
 0x12c   : > { %v946_v13 = vsel %vm634_vm1, %v944_v19, %v3568_v35  ;;  %v1104_v21 = vrot.slane %v1046_v4, 1  ;;  %v3570_v46 = vrot.slane %v2942_v48, 1  ;;  %v1228_v41 = vrot.slane %v1170_v2, 2 }
 0x12d   : > { %v737_v8 = vadd.f32 %v721_v26, %v701_v61  ;;  %v428_v11 = vmul.f32 %v2555_v52, %v2571_v59  ;;  %1780 = vmatprep.mubr.f32.mxu0 %v1261_v22  ;;  %v1229_v24 = vrot.slane %v2951_v29, 2  ;;  %v466_v58 = vmul.f32 %v2557_v53, %v2738_v20  ;;  %v2973_v22 = vld [vmem:[#allocation2 + $0x58] sm:$0x3] }
 0x12e   : > { %v591_v7 = vmul.f32 %v2560_v54, %v2738_v20  ;;  %v714_v19 = vmul.f32 %v2562_v55, %v2610_v18  ;;  %v1106_v26 = vsel %vm509_vm0, %v1104_v21, %v3570_v46  ;;  %v752_v59 = vmul.f32 %v2564_v56, %v2753_v36 }
 0x12f   : > { %v861_v4 = vadd.f32 %v822_v33, %v737_v8  ;;  %v876_v61 = vmul.f32 %v2567_v57, %v2753_v36  ;;  %v1230_v2 = vsel %vm634_vm1, %v1228_v41, %v1229_v24  ;;  %v518_v20 = vrot.slane %v466_v58, 1 }
 0x130   : > { %v643_v35 = vrot.slane %v591_v7, 2  ;;  %v998_v33 = vmul.f32 %v2604_v15, %v2864_v51  ;;  %v803_v3 = vrot.slane %v752_v59, 1  ;;  %v1036_v46 = vmul.f32 %v2606_v16, %v2973_v22 }
 0x131   : > { %v985_v8 = vadd.f32 %v946_v13, %v861_v4  ;;  %v927_v21 = vrot.slane %v876_v61, 2  ;;  %v519_v1 = vsel %vm509_vm0, %v516_v9, %v518_v20  ;;  %v1160_v58 = vmul.f32 %v2637_v30, %v2973_v22 }
 0x132   : > { %v644_v41 = vsel %vm634_vm1, %v641_v14, %v643_v35  ;;  %v436_v7 = vmul.f32 %v2555_v52, %v2671_v60  ;;  %v569_v4 = vadd.f32 %v519_v1, %v428_v11  ;;  %v804_v59 = vsel %vm509_vm0, %v801_v12, %v803_v3 }
 0x133   : > { %v1021_v13 = vadd.f32 %v1005_v63, %v985_v8  ;;  %v928_v42 = vsel %vm634_vm1, %v925_v5, %v927_v21  ;;  %v1087_v9 = vrot.slane %v1036_v46, 1  ;;  %v1211_v28 = vrot.slane %v1160_v58, 2 }
 0x134   : > { %v478_v14 = vmul.f32 %v2557_v53, %v2777_v34  ;;  %v603_v35 = vmul.f32 %v2560_v54, %v2777_v34  ;;  %v694_v20 = vadd.f32 %v644_v41, %v569_v4  ;;  %v722_v1 = vmul.f32 %v2562_v55, %v2699_v25 }
 0x135   : > { %v1145_v61 = vadd.f32 %v1106_v26, %v1021_v13  ;;  %v764_v43 = vmul.f32 %v2564_v56, %v2793_v44  ;;  %v1088_v12 = vsel %vm509_vm0, %v1085_v47, %v1087_v9  ;;  %v3607_v45 = vrot.slane %v2878_v32, 2  ;;  %v3009_v26 = vld [vmem:[#allocation2 + $0xb8] sm:$0x3] }
 0x136   : > { %v538_v3 = vrot.slane %v478_v14, 1  ;;  %v663_v63 = vrot.slane %v603_v35, 2  ;;  %v730_v46 = vadd.f32 %v714_v19, %v694_v20  ;;  %v888_v21 = vmul.f32 %v2567_v57, %v2793_v44 }
 0x137   : > { %v1212_v5 = vsel %vm634_vm1, %v3607_v45, %v1211_v28  ;;  %v1269_v11 = vadd.f32 %v1230_v2, %v1145_v61  ;;  %v823_v8 = vrot.slane %v764_v43, 1  ;;  %v3608_v41 = vrot.slane %v2891_v0, 1 }
 0x138   : > { %v3609_v47 = vrot.slane %v2903_v62, 2  ;;  %v1006_v58 = vmul.f32 %v2604_v15, %v2932_v39  ;;  %v1048_v19 = vmul.f32 %v2606_v16, %v3009_v26  ;;  %v854_v2 = vadd.f32 %v804_v59, %v730_v46 }
 0x139   : > { %v539_v6 = vsel %vm509_vm0, %v3608_v41, %v538_v3  ;;  %1792 = vmatprep.mubr.f32.mxu1 %v1269_v11  ;;  %v3610_v4 = vrot.slane %v2915_v38, 1  ;;  %v947_v0 = vrot.slane %v888_v21, 2  ;;  %v1172_v62 = vmul.f32 %v2637_v30, %v3009_v26 }
 0x13a   : > { %v664_v32 = vsel %vm634_vm1, %v3609_v47, %v663_v63  ;;  %v577_v13 = vadd.f32 %v539_v6, %v436_v7  ;;  %v1107_v28 = vrot.slane %v1048_v19, 1  ;;  %v429_v14 = vmul.f32 %v2555_v52, %v2608_v17 }
 0x13b   : > { %v824_v9 = vsel %vm509_vm0, %v3610_v4, %v823_v8  ;;  %v467_v35 = vmul.f32 %v2557_v53, %v2608_v17  ;;  %v978_v61 = vadd.f32 %v928_v42, %v854_v2  ;;  %v3611_v59 = vrot.slane %v2924_v49, 2 }
 0x13c   : > { %v702_v20 = vadd.f32 %v664_v32, %v577_v13  ;;  %v3037_v38 = vmul.f32 %v2557_v53, %v2610_v18  ;;  %v3612_v43 = vrot.slane %v2942_v48, 1  ;;  %v1231_v3 = vrot.slane %v1172_v62, 2 }
 0x13d   : > { %v948_v7 = vsel %vm634_vm1, %v3611_v59, %v947_v0  ;;  %v520_v63 = vrot.slane %v467_v35, 1  ;;  %v592_v11 = vmul.f32 %v2560_v54, %v2608_v17  ;;  %v1014_v46 = vadd.f32 %v998_v33, %v978_v61 }
 0x13e   : > { %v1108_v45 = vsel %vm509_vm0, %v3612_v43, %v1107_v28  ;;  %v738_v42 = vadd.f32 %v722_v1, %v702_v20  ;;  %v521_v8 = vrot.slane %v3037_v38, 1  ;;  %v3047_v49 = vmul.f32 %v2560_v54, %v2610_v18 }
 0x13f   : > { %v1232_v21 = vsel %vm634_vm1, %v1229_v24, %v1231_v3  ;;  %v645_v48 = vrot.slane %v592_v11, 2  ;;  %v715_v41 = vmul.f32 %v2562_v55, %v2850_v37  ;;  %v753_v6 = vmul.f32 %v2564_v56, %v2850_v37 }
 0x140   : > { %v1138_v17 = vadd.f32 %v1088_v12, %v1014_v46  ;;  %v862_v33 = vadd.f32 %v824_v9, %v738_v42  ;;  %v522_v1 = vsel %vm509_vm0, %v520_v63, %v521_v8  ;;  %v646_v47 = vrot.slane %v3047_v49, 2 }
 0x141   : > { %v570_v32 = vadd.f32 %v522_v1, %v429_v14  ;;  %v3062_v29 = vmul.f32 %v2564_v56, %v2864_v51  ;;  %v805_v24 = vrot.slane %v753_v6, 1  ;;  %v877_v19 = vmul.f32 %v2567_v57, %v2850_v37 }
 0x142   : > { %v1262_v2 = vadd.f32 %v1212_v5, %v1138_v17  ;;  %v986_v13 = vadd.f32 %v948_v7, %v862_v33  ;;  %v647_v12 = vsel %vm634_vm1, %v645_v48, %v646_v47  ;;  %v3071_v4 = vmul.f32 %v2567_v57, %v2864_v51 }
 0x143   : > { %v695_v9 = vadd.f32 %v647_v12, %v570_v32  ;;  %v806_v0 = vrot.slane %v3062_v29, 1  ;;  %v929_v28 = vrot.slane %v877_v19, 2  ;;  %v999_v62 = vmul.f32 %v2604_v15, %v2619_v23 }
 0x144   : > { %1781 = vmatmul.mubr.f32.gmra.mrb[2].mxu0 %v1262_v2  ;;  %v1022_v14 = vadd.f32 %v1006_v58, %v986_v13  ;;  %v930_v5 = vrot.slane %v3071_v4, 2  ;;  %v1037_v35 = vmul.f32 %v2606_v16, %v2619_v23  ;;  %v3081_v61 = vmul.f32 %v2606_v16, %v2629_v27 }
 0x145   : > { %v731_v20 = vadd.f32 %v715_v41, %v695_v9  ;;  %v807_v59 = vsel %vm509_vm0, %v805_v24, %v806_v0  ;;  %v1161_v7 = vmul.f32 %v2637_v30, %v2619_v23  ;;  %v3090_v58 = vmul.f32 %v2637_v30, %v2629_v27 }
 0x146   : > { %v1146_v43 = vadd.f32 %v1108_v45, %v1022_v14  ;;  %v931_v3 = vsel %vm634_vm1, %v929_v28, %v930_v5  ;;  %v1089_v63 = vrot.slane %v1037_v35, 1  ;;  %v1090_v11 = vrot.slane %v3081_v61, 1 }
 0x147   : > { %v855_v46 = vadd.f32 %v807_v59, %v731_v20  ;;  %v1213_v42 = vrot.slane %v1161_v7, 2  ;;  %v1214_v48 = vrot.slane %v3090_v58, 2  ;;  %v437_v41 = vmul.f32 %v2555_v52, %v2690_v10 }
 0x148   : > { %v1270_v6 = vadd.f32 %v1232_v21, %v1146_v43  ;;  %v1091_v17 = vsel %vm509_vm0, %v1089_v63, %v1090_v11  ;;  %v479_v45 = vmul.f32 %v2557_v53, %v2690_v10  ;;  %v3106_v33 = vmul.f32 %v2557_v53, %v2699_v25  ;;  %v3136_v43 = vld [vmem:[#allocation2 + $0xc0] sm:$0xff] }
 0x149   : > { %v979_v1 = vadd.f32 %v931_v3, %v855_v46  ;;  %v1215_v32 = vsel %vm634_vm1, %v1213_v42, %v1214_v48  ;;  %v604_v24 = vmul.f32 %v2560_v54, %v2690_v10  ;;  %v3115_v21 = vmul.f32 %v2560_v54, %v2699_v25  ;;  %v3142_v42 = vld [vmem:[#allocation2 + $0xc8] sm:$0xff] }
 0x14a   : > { %1793 = vmatmul.mubr.f32.gmra.mrb[2].mxu1 %v1270_v6  ;;  %v540_v19 = vrot.slane %v479_v45, 1  ;;  %v3577_v2 = vrot.slane %v3106_v33, 1  ;;  %v723_v13 = vmul.f32 %v2562_v55, %v2908_v31  ;;  %v765_v12 = vmul.f32 %v2564_v56, %v2908_v31 }
 0x14b   : > { %v1015_v9 = vadd.f32 %v999_v62, %v979_v1  ;;  %v665_v28 = vrot.slane %v604_v24, 2  ;;  %v3574_v14 = vrot.slane %v3115_v21, 2  ;;  %v3125_v10 = vmul.f32 %v2564_v56, %v2932_v39 }
 0x14c   : > { %v542_v35 = vsel %vm509_vm0, %v540_v19, %v3577_v2  ;;  %v825_v20 = vrot.slane %v765_v12, 1  ;;  %v889_v59 = vmul.f32 %v2567_v57, %v2908_v31  ;;  %v3134_v7 = vmul.f32 %v2567_v57, %v2932_v39 }
 0x14d   : > { %v1139_v62 = vadd.f32 %v1091_v17, %v1015_v9  ;;  %v578_v3 = vadd.f32 %v542_v35, %v437_v41  ;;  %v667_v63 = vsel %vm634_vm1, %v665_v28, %v3574_v14  ;;  %v3573_v46 = vrot.slane %v3125_v10, 1 }
 0x14e   : > { %v949_v6 = vrot.slane %v889_v59, 2  ;;  %v3572_v45 = vrot.slane %v3134_v7, 2  ;;  %v1007_v1 = vmul.f32 %v2604_v15, %v3136_v43  ;;  %v1049_v17 = vmul.f32 %v2606_v16, %v3136_v43 }
 0x14f   : > { %v1263_v24 = vadd.f32 %v1215_v32, %v1139_v62  ;;  %v703_v19 = vadd.f32 %v667_v63, %v578_v3  ;;  %v827_v41 = vsel %vm509_vm0, %v825_v20, %v3573_v46  ;;  %v3154_v12 = vmul.f32 %v2606_v16, %v3142_v42 }
 0x150   : > { %v951_v9 = vsel %vm634_vm1, %v949_v6, %v3572_v45  ;;  %v1109_v28 = vrot.slane %v1049_v17, 1  ;;  %v1173_v35 = vmul.f32 %v2637_v30, %v3136_v43  ;;  %v3163_v32 = vmul.f32 %v2637_v30, %v3142_v42 }
 0x151   : > { %1783 = vmatprep.mubr.f32.mxu0 %v1263_v24  ;;  %v739_v59 = vadd.f32 %v723_v13, %v703_v19  ;;  %v3575_v20 = vrot.slane %v3154_v12, 1  ;;  %v430_v62 = vmul.f32 %v2555_v52, %v2610_v18  ;;  %v469_v3 = vmul.f32 %v2557_v53, %v2753_v36 }
 0x152   : > { %v1233_v63 = vrot.slane %v1173_v35, 2  ;;  %v3576_v6 = vrot.slane %v3163_v32, 2  ;;  %v594_v17 = vmul.f32 %v2560_v54, %v2753_v36  ;;  %v716_v45 = vmul.f32 %v2562_v55, %v2864_v51 }
 0x153   : > { %v863_v46 = vadd.f32 %v827_v41, %v739_v59  ;;  %v1111_v13 = vsel %vm509_vm0, %v1109_v28, %v3575_v20  ;;  %v523_v24 = vrot.slane %v469_v3, 1  ;;  %v755_v18 = vmul.f32 %v2564_v56, %v2973_v22 }
 0x154   : > { %v1235_v19 = vsel %vm634_vm1, %v1233_v63, %v3576_v6  ;;  %v648_v35 = vrot.slane %v594_v17, 2  ;;  %v879_v36 = vmul.f32 %v2567_v57, %v2973_v22  ;;  %v1000_v14 = vmul.f32 %v2604_v15, %v2629_v27 }
 0x155   : > { %v987_v41 = vadd.f32 %v951_v9, %v863_v46  ;;  %v524_v28 = vsel %vm509_vm0, %v521_v8, %v523_v24  ;;  %v808_v59 = vrot.slane %v755_v18, 1  ;;  %v1039_v3 = vmul.f32 %v2606_v16, %v2759_v40 }
 0x156   : > { %v571_v20 = vadd.f32 %v524_v28, %v430_v62  ;;  %v649_v63 = vsel %vm634_vm1, %v646_v47, %v648_v35  ;;  %v932_v17 = vrot.slane %v879_v36, 2  ;;  %v1163_v6 = vmul.f32 %v2637_v30, %v2759_v40 }
 0x157   : > { %v1023_v2 = vadd.f32 %v1007_v1, %v987_v41  ;;  %v809_v38 = vsel %vm509_vm0, %v806_v0, %v808_v59  ;;  %v1092_v46 = vrot.slane %v1039_v3, 1  ;;  %v438_v8 = vmul.f32 %v2555_v52, %v2699_v25 }
 0x158   : > { %v696_v9 = vadd.f32 %v649_v63, %v571_v20  ;;  %v933_v49 = vsel %vm634_vm1, %v930_v5, %v932_v17  ;;  %v1216_v62 = vrot.slane %v1163_v6, 2  ;;  %v481_v47 = vmul.f32 %v2557_v53, %v2793_v44  ;;  %v3219_v6 = vld [vmem:[#allocation2 + $0xd0] sm:$0x3] }
 0x159   : > { %v1147_v24 = vadd.f32 %v1111_v13, %v1023_v2  ;;  %v1093_v29 = vsel %vm509_vm0, %v1090_v11, %v1092_v46  ;;  %v606_v0 = vmul.f32 %v2560_v54, %v2793_v44  ;;  %v724_v25 = vmul.f32 %v2562_v55, %v2932_v39 }
 0x15a   : > { %v732_v1 = vadd.f32 %v716_v45, %v696_v9  ;;  %v1217_v4 = vsel %vm634_vm1, %v1214_v48, %v1216_v62  ;;  %v543_v5 = vrot.slane %v481_v47, 1  ;;  %v767_v20 = vmul.f32 %v2564_v56, %v3009_v26 }
 0x15b   : > { %v1271_v2 = vadd.f32 %v1235_v19, %v1147_v24  ;;  %v668_v61 = vrot.slane %v606_v0, 2  ;;  %v891_v11 = vmul.f32 %v2567_v57, %v3009_v26  ;;  %v1008_v44 = vmul.f32 %v2604_v15, %v3142_v42 }
 0x15c   : > { %v856_v13 = vadd.f32 %v809_v38, %v732_v1  ;;  %v3613_v45 = vrot.slane %v3106_v33, 1  ;;  %v828_v48 = vrot.slane %v767_v20, 1  ;;  %v1051_v18 = vmul.f32 %v2606_v16, %v3219_v6 }
 0x15d   : > { %1795 = vmatprep.mubr.f32.mxu1 %v1271_v2  ;;  %v3614_v35 = vrot.slane %v3115_v21, 2  ;;  %v952_v41 = vrot.slane %v891_v11, 2  ;;  %v1175_v28 = vmul.f32 %v2637_v30, %v3219_v6  ;;  %v3615_v3 = vrot.slane %v3125_v10, 1 }
 0x15e   : > { %v544_v58 = vsel %vm509_vm0, %v3613_v45, %v543_v5  ;;  %v980_v59 = vadd.f32 %v933_v49, %v856_v13  ;;  %v1112_v63 = vrot.slane %v1051_v18, 1  ;;  %v431_v17 = vmul.f32 %v2555_v52, %v2850_v37 }
 0x15f   : > { %v579_v19 = vadd.f32 %v544_v58, %v438_v8  ;;  %v669_v36 = vsel %vm634_vm1, %v3614_v35, %v668_v61  ;;  %v829_v33 = vsel %vm509_vm0, %v3615_v3, %v828_v48  ;;  %v3616_v46 = vrot.slane %v3134_v7, 2 }
 0x160   : > { %v1236_v8 = vrot.slane %v1175_v28, 2  ;;  %v470_v9 = vmul.f32 %v2557_v53, %v2850_v37  ;;  %v1016_v62 = vadd.f32 %v1000_v14, %v980_v59  ;;  %v3617_v49 = vrot.slane %v3154_v12, 1 }
 0x161   : > { %v704_v38 = vadd.f32 %v669_v36, %v579_v19  ;;  %v953_v21 = vsel %vm634_vm1, %v3616_v46, %v952_v41  ;;  %v3250_v47 = vmul.f32 %v2557_v53, %v2864_v51  ;;  %v595_v24 = vmul.f32 %v2560_v54, %v2850_v37 }
 0x162   : > { %v1113_v10 = vsel %vm509_vm0, %v3617_v49, %v1112_v63  ;;  %v3618_v7 = vrot.slane %v3163_v32, 2  ;;  %v525_v5 = vrot.slane %v470_v9, 1  ;;  %v3259_v14 = vmul.f32 %v2560_v54, %v2864_v51 }
 0x163   : > { %v740_v0 = vadd.f32 %v724_v25, %v704_v38  ;;  %v1140_v12 = vadd.f32 %v1093_v29, %v1016_v62  ;;  %v526_v20 = vrot.slane %v3250_v47, 1  ;;  %v650_v2 = vrot.slane %v595_v24, 2 }
 0x164   : > { %v1237_v1 = vsel %vm634_vm1, %v3618_v7, %v1236_v8  ;;  %v717_v61 = vmul.f32 %v2562_v55, %v2619_v23  ;;  %v651_v37 = vrot.slane %v3259_v14, 2  ;;  %v756_v32 = vmul.f32 %v2564_v56, %v2619_v23 }
 0x165   : > { %v864_v11 = vadd.f32 %v829_v33, %v740_v0  ;;  %v3269_v25 = vmul.f32 %v2564_v56, %v2629_v27  ;;  %v1264_v13 = vadd.f32 %v1217_v4, %v1140_v12  ;;  %v527_v29 = vsel %vm509_vm0, %v525_v5, %v526_v20 }
 0x166   : > { %v880_v45 = vmul.f32 %v2567_v57, %v2619_v23  ;;  %v3278_v58 = vmul.f32 %v2567_v57, %v2629_v27  ;;  %v572_v18 = vadd.f32 %v527_v29, %v431_v17  ;;  %v652_v19 = vsel %vm634_vm1, %v650_v2, %v651_v37 }
 0x167   : > { %v988_v48 = vadd.f32 %v953_v21, %v864_v11  ;;  %v810_v35 = vrot.slane %v756_v32, 1  ;;  %1784 = vmatmul.mubr.f32.gmra.mrb[4].mxu0 %v1264_v13  ;;  %v811_v4 = vrot.slane %v3269_v25, 1  ;;  %v1001_v23 = vmul.f32 %v2604_v15, %v2668_v50  ;;  %v415_v13 = vld [vmem:[#allocation2 + $0xd8] sm:$0xff] }
 0x168   : > { %v934_v36 = vrot.slane %v880_v45, 2  ;;  %v935_v41 = vrot.slane %v3278_v58, 2  ;;  %v697_v59 = vadd.f32 %v652_v19, %v572_v18  ;;  %v1040_v27 = vmul.f32 %v2606_v16, %v2668_v50  ;;  %v3339_v19 = vld [vmem:[#allocation2 + $0xe0] sm:$0xff] }
 0x169   : > { %v1024_v28 = vadd.f32 %v1008_v44, %v988_v48  ;;  %v3291_v3 = vmul.f32 %v2606_v16, %v2671_v60  ;;  %v812_v33 = vsel %vm509_vm0, %v810_v35, %v811_v4  ;;  %v1164_v17 = vmul.f32 %v2637_v30, %v2668_v50 }
 0x16a   : > { %v936_v63 = vsel %vm634_vm1, %v934_v36, %v935_v41  ;;  %v3303_v44 = vmul.f32 %v2637_v30, %v2671_v60  ;;  %v733_v46 = vadd.f32 %v717_v61, %v697_v59  ;;  %v1094_v21 = vrot.slane %v1040_v27, 1 }
 0x16b   : > { %v1148_v38 = vadd.f32 %v1113_v10, %v1024_v28  ;;  %v1095_v8 = vrot.slane %v3291_v3, 1  ;;  %v1218_v9 = vrot.slane %v1164_v17, 2  ;;  %v439_v49 = vmul.f32 %v2555_v52, %v2908_v31 }
 0x16c   : > { %v1219_v62 = vrot.slane %v3303_v44, 2  ;;  %v482_v24 = vmul.f32 %v2557_v53, %v2908_v31  ;;  %v857_v50 = vadd.f32 %v812_v33, %v733_v46  ;;  %v3316_v10 = vmul.f32 %v2557_v53, %v2932_v39 }
 0x16d   : > { %v1272_v0 = vadd.f32 %v1237_v1, %v1148_v38  ;;  %v1096_v60 = vsel %vm509_vm0, %v1094_v21, %v1095_v8  ;;  %v607_v12 = vmul.f32 %v2560_v54, %v2908_v31  ;;  %v3325_v1 = vmul.f32 %v2560_v54, %v2932_v39 }
 0x16e   : > { %v1220_v7 = vsel %vm634_vm1, %v1218_v9, %v1219_v62  ;;  %v545_v5 = vrot.slane %v482_v24, 1  ;;  %v981_v2 = vadd.f32 %v936_v63, %v857_v50  ;;  %v546_v61 = vrot.slane %v3316_v10, 1 }
 0x16f   : > { %1796 = vmatmul.mubr.f32.gmra.mrb[4].mxu1 %v1272_v0  ;;  %v725_v11 = vmul.f32 %v2562_v55, %v3136_v43  ;;  %v768_v32 = vmul.f32 %v2564_v56, %v3136_v43  ;;  %v670_v29 = vrot.slane %v607_v12, 2  ;;  %v671_v45 = vrot.slane %v3325_v1, 2 }
 0x170   : > { %v3335_v31 = vmul.f32 %v2564_v56, %v3142_v42  ;;  %v892_v48 = vmul.f32 %v2567_v57, %v3136_v43  ;;  %v1017_v18 = vadd.f32 %v1001_v23, %v981_v2  ;;  %v547_v35 = vsel %vm509_vm0, %v545_v5, %v546_v61 }
 0x171   : > { %v830_v36 = vrot.slane %v768_v32, 1  ;;  %v3346_v28 = vmul.f32 %v2567_v57, %v3142_v42  ;;  %v580_v59 = vadd.f32 %v547_v35, %v439_v49  ;;  %v672_v27 = vsel %vm634_vm1, %v670_v29, %v671_v45 }
 0x172   : > { %v831_v33 = vrot.slane %v3335_v31, 1  ;;  %v954_v43 = vrot.slane %v892_v48, 2  ;;  %v1141_v23 = vadd.f32 %v1096_v60, %v1017_v18  ;;  %v1052_v17 = vmul.f32 %v2606_v16, %v415_v13 }
 0x173   : > { %v955_v63 = vrot.slane %v3346_v28, 2  ;;  %v705_v38 = vadd.f32 %v672_v27, %v580_v59  ;;  %v3356_v46 = vmul.f32 %v2606_v16, %v3339_v19  ;;  %v1176_v49 = vmul.f32 %v2637_v30, %v415_v13 }
 0x174   : > { %v1265_v21 = vadd.f32 %v1220_v7, %v1141_v23  ;;  %v832_v9 = vsel %vm509_vm0, %v830_v36, %v831_v33  ;;  %v3364_v24 = vmul.f32 %v2637_v30, %v3339_v19  ;;  %v1009_v60 = vmul.f32 %v2604_v15, %v415_v13 }
 0x175   : > { %v741_v0 = vadd.f32 %v725_v11, %v705_v38  ;;  %v956_v50 = vsel %vm634_vm1, %v954_v43, %v955_v63  ;;  %v1114_v5 = vrot.slane %v1052_v17, 1  ;;  %v1115_v7 = vrot.slane %v3356_v46, 1  ;;  %v1959_v17 = vld [vmem:[#allocation2 + $0x68] sm:$0xff] }
 0x176   : > { %1786 = vmatprep.mubr.f32.mxu0 %v1265_v21  ;;  %v472_v12 = vmul.f32 %v2557_v53, %v2973_v22  ;;  %v597_v2 = vmul.f32 %v2560_v54, %v2973_v22  ;;  %v432_v11 = vmul.f32 %v2555_v52, %v2864_v51  ;;  %v758_v29 = vmul.f32 %v2564_v56, %v2759_v40 }
 0x177   : > { %v865_v32 = vadd.f32 %v832_v9, %v741_v0  ;;  %v882_v13 = vmul.f32 %v2567_v57, %v2759_v40  ;;  %v1238_v48 = vrot.slane %v1176_v49, 2  ;;  %v1239_v18 = vrot.slane %v3364_v24, 2 }
 0x178   : > { %v528_v35 = vrot.slane %v472_v12, 1  ;;  %v653_v36 = vrot.slane %v597_v2, 2  ;;  %v1116_v22 = vsel %vm509_vm0, %v1114_v5, %v1115_v7  ;;  %v813_v43 = vrot.slane %v758_v29, 1 }
 0x179   : > { %v989_v59 = vadd.f32 %v956_v50, %v865_v32  ;;  %v718_v38 = vmul.f32 %v1959_v17, %v2562_v55  ;;  %v937_v21 = vrot.slane %v882_v13, 2  ;;  %v1240_v9 = vsel %vm634_vm1, %v1238_v48, %v1239_v18 }
 0x17a   : > { %v529_v51 = vsel %vm509_vm0, %v526_v20, %v528_v35  ;;  %v654_v27 = vsel %vm634_vm1, %v651_v37, %v653_v36  ;;  %v1042_v47 = vmul.f32 %v2606_v16, %v2777_v34  ;;  %v484_v20 = vmul.f32 %v2557_v53, %v3009_v26 }
 0x17b   : > { %v1025_v40 = vadd.f32 %v1009_v60, %v989_v59  ;;  %v573_v23 = vadd.f32 %v529_v51, %v432_v11  ;;  %v609_v14 = vmul.f32 %v2560_v54, %v3009_v26  ;;  %v440_v0 = vmul.f32 %v2555_v52, %v2932_v39  ;;  %v417_v26 = vld [vmem:[#allocation2 + $0xe8] sm:$0x3]  ;;  %v1960_v11 = vld [vmem:[#allocation2 + $0x80] sm:$0xff] }
 0x17c   : > { %v770_v50 = vmul.f32 %v2564_v56, %v3219_v6  ;;  %v814_v60 = vsel %vm509_vm0, %v811_v4, %v813_v43  ;;  %v1166_v5 = vmul.f32 %v2637_v30, %v2777_v34  ;;  %v548_v12 = vrot.slane %v484_v20, 1 }
 0x17d   : > { %v1149_v37 = vadd.f32 %v1116_v22, %v1025_v40  ;;  %v698_v49 = vadd.f32 %v654_v27, %v573_v23  ;;  %v673_v53 = vrot.slane %v609_v14, 2  ;;  %v938_v54 = vsel %vm634_vm1, %v935_v41, %v937_v21 }
 0x17e   : > { %v894_v52 = vmul.f32 %v2567_v57, %v3219_v6  ;;  %v1097_v56 = vrot.slane %v1042_v47, 1  ;;  %v549_v39 = vsel %vm509_vm0, %v546_v61, %v548_v12  ;;  %v833_v25 = vrot.slane %v770_v50, 1 }
 0x17f   : > { %v1273_v2 = vadd.f32 %v1240_v9, %v1149_v37  ;;  %v734_v32 = vadd.f32 %v718_v38, %v698_v49  ;;  %v674_v34 = vsel %vm634_vm1, %v671_v45, %v673_v53  ;;  %v1002_v58 = vmul.f32 %v1960_v11, %v2604_v15 }
 0x180   : > { %v581_v41 = vadd.f32 %v549_v39, %v440_v0  ;;  %v726_v29 = vmul.f32 %v2562_v55, %v3142_v42  ;;  %v1221_v57 = vrot.slane %v1166_v5, 2  ;;  %v957_v6 = vrot.slane %v894_v52, 2 }
 0x181   : > { %1798 = vmatprep.mubr.f32.mxu1 %v1273_v2  ;;  %v858_v4 = vadd.f32 %v814_v60, %v734_v32  ;;  %v1054_v10 = vmul.f32 %v2606_v16, %v417_v26  ;;  %v1098_v1 = vsel %vm509_vm0, %v1095_v8, %v1097_v56  ;;  %v834_v45 = vsel %vm509_vm0, %v831_v33, %v833_v25 }
 0x182   : > { %v706_v61 = vadd.f32 %v674_v34, %v581_v41  ;;  %v1178_v48 = vmul.f32 %v2637_v30, %v417_v26  ;;  %v1222_v55 = vsel %vm634_vm1, %v1219_v62, %v1221_v57  ;;  %v958_v16 = vsel %vm634_vm1, %v955_v63, %v957_v6 }
 0x183   : > { %v982_v13 = vadd.f32 %v938_v54, %v858_v4  ;;  %v1117_v42 = vrot.slane %v1054_v10, 1  ;;  %v1010_v8 = vmul.f32 %v2604_v15, %v3339_v19  ;;  %v3449_v15 = vld [vmem:[%s3549_s4] ss:$0 sm:$0xff] }
 0x184   : > { %v742_v36 = vadd.f32 %v726_v29, %v706_v61  ;;  %v1241_v31 = vrot.slane %v1178_v48, 2 }
 0x185   : > { %v1018_v35 = vadd.f32 %v1002_v58, %v982_v13  ;;  %v1118_v30 = vsel %vm509_vm0, %v1115_v7, %v1117_v42 }
 0x186   : > { %v866_v59 = vadd.f32 %v834_v45, %v742_v36  ;;  %v1242_v62 = vsel %vm634_vm1, %v1239_v18, %v1241_v31 }
 0x187   : > { %v1142_v3 = vadd.f32 %v1098_v1, %v1018_v35 }
 0x188   : > { %v990_v22 = vadd.f32 %v958_v16, %v866_v59 }
 0x189   : > { %v1266_v33 = vadd.f32 %v1222_v55, %v1142_v3 }
 0x18a   : > { %v1026_v44 = vadd.f32 %v1010_v8, %v990_v22 }
 0x18b   : > { %1787 = vmatmul.mubr.f32.gmra.mrb[6].mxu0 %v1266_v33 }
 0x18c   : > { %v1150_v28 = vadd.f32 %v1118_v30, %v1026_v44 }
 0x18e   : > { %v1274_v63 = vadd.f32 %v1242_v62, %v1150_v28 }
 0x190   : > { %1799 = vmatmul.mubr.f32.gmra.mrb[6].mxu1 %v1274_v63 }
 0x1f2   : > { %v1779_v19 = vpop.f32.mrb[0].mxu0 }
 0x1f3   : > { %v1370_v51 = vadd.f32 %v1779_v19, %v3449_v15  ;;  %v1364_v46 = vpop.f32.mrb[1].mxu0 }
 0x1f4   : > { %v1365_v7 = vadd.f32 %v3449_v15, %v1364_v46 }
 0x1f5   : > { %v1444_v27 = vadd.f32 3.0, %v1370_v51 }
 0x1f6   : > { %v1443_v43 = vadd.f32 3.0, %v1365_v7 }
 0x1f7   : > { %v1460_v40 = vmax.f32 %v1444_v27, 0.0 }
 0x1f8   : > { %v1791_v24 = vpop.f32.mrb[0].mxu1  ;;  %v1459_v18 = vmax.f32 %v1443_v43, 0.0 }
 0x1f9   : > { %v1476_v23 = vmin.f32 %v1460_v40, 6.0  ;;  %v1410_v17 = vadd.f32 %v1791_v24, %v3449_v15  ;;  %v1404_v38 = vpop.f32.mrb[1].mxu1 }
 0x1fa   : > { %v1475_v21 = vmin.f32 %v1459_v18, 6.0  ;;  %v1405_v9 = vadd.f32 %v3449_v15, %v1404_v38 }
 0x1fb   : > { %v1492_v47 = vmul.f32 %v1476_v23, %v1370_v51  ;;  %v1452_v20 = vadd.f32 3.0, %v1410_v17 }
 0x1fc   : > { %v1491_v14 = vmul.f32 %v1475_v21, %v1365_v7  ;;  %v1451_v37 = vadd.f32 3.0, %v1405_v9 }
 0x1fd   : > { %v1508_v49 = vmul.f32 0.16666667, %v1492_v47  ;;  %v1468_v0 = vmax.f32 %v1452_v20, 0.0 }
 0x1fe   : > { %v1507_v50 = vmul.f32 0.16666667, %v1491_v14  ;;  %v1467_v60 = vmax.f32 %v1451_v37, 0.0 }
 0x1ff   : > { %1524 = vst [vmem:[%s2505_s30 + $0x8] sm:$0xff] %v1508_v49  ;;  %v1484_v5 = vmin.f32 %v1468_v0, 6.0 }
 0x200   : > { %1523 = vst [vmem:[%s2505_s30] sm:$0xff] %v1507_v50  ;;  %v1483_v12 = vmin.f32 %v1467_v60, 6.0 }
 0x201   : > { %v1500_v53 = vmul.f32 %v1484_v5, %v1410_v17 }
 0x202   : > { %v1499_v2 = vmul.f32 %v1483_v12, %v1405_v9 }
 0x203   : > { %v1516_v32 = vmul.f32 0.16666667, %v1500_v53 }
 0x204   : > { %v1515_v54 = vmul.f32 0.16666667, %v1499_v2 }
 0x205   : > { %1532 = vst [vmem:[%s2505_s30 + $0x48] sm:$0xff] %v1516_v32 }
 0x206   : > { %1531 = vst [vmem:[%s2505_s30 + $0x40] sm:$0xff] %v1515_v54 }
 0x217   : > { %v1782_v26 = vpop.f32.mrb[2].mxu0 }
 0x218   : > { %v1380_v52 = vadd.f32 %v1782_v26, %v3449_v15  ;;  %v1374_v56 = vpop.f32.mrb[3].mxu0 }
 0x219   : > { %v1375_v39 = vadd.f32 %v3449_v15, %v1374_v56 }
 0x21a   : > { %v1446_v34 = vadd.f32 3.0, %v1380_v52 }
 0x21b   : > { %v1445_v25 = vadd.f32 3.0, %v1375_v39 }
 0x21c   : > { %v1462_v4 = vmax.f32 %v1446_v34, 0.0 }
 0x21d   : > { %v1794_v11 = vpop.f32.mrb[2].mxu1  ;;  %v1461_v58 = vmax.f32 %v1445_v25, 0.0 }
 0x21e   : > { %v1478_v41 = vmin.f32 %v1462_v4, 6.0  ;;  %v1420_v29 = vadd.f32 %v1794_v11, %v3449_v15  ;;  %v1414_v57 = vpop.f32.mrb[3].mxu1 }
 0x21f   : > { %v1477_v6 = vmin.f32 %v1461_v58, 6.0  ;;  %v1415_v10 = vadd.f32 %v3449_v15, %v1414_v57 }
 0x220   : > { %v1494_v13 = vmul.f32 %v1478_v41, %v1380_v52  ;;  %v1454_v61 = vadd.f32 3.0, %v1420_v29 }
 0x221   : > { %v1493_v1 = vmul.f32 %v1477_v6, %v1375_v39  ;;  %v1453_v45 = vadd.f32 3.0, %v1415_v10 }
 0x222   : > { %v1510_v48 = vmul.f32 0.16666667, %v1494_v13  ;;  %v1470_v35 = vmax.f32 %v1454_v61, 0.0 }
 0x223   : > { %v1509_v36 = vmul.f32 0.16666667, %v1493_v1  ;;  %v1469_v55 = vmax.f32 %v1453_v45, 0.0 }
 0x224   : > { %1526 = vst [vmem:[%s2505_s30 + $0x18] sm:$0xff] %v1510_v48  ;;  %v1486_v16 = vmin.f32 %v1470_v35, 6.0 }
 0x225   : > { %1525 = vst [vmem:[%s2505_s30 + $0x10] sm:$0xff] %v1509_v36  ;;  %v1485_v42 = vmin.f32 %v1469_v55, 6.0 }
 0x226   : > { %v1502_v3 = vmul.f32 %v1486_v16, %v1420_v29 }
 0x227   : > { %v1501_v59 = vmul.f32 %v1485_v42, %v1415_v10 }
 0x228   : > { %v1518_v8 = vmul.f32 0.16666667, %v1502_v3 }
 0x229   : > { %v1517_v31 = vmul.f32 0.16666667, %v1501_v59 }
 0x22a   : > { %1534 = vst [vmem:[%s2505_s30 + $0x58] sm:$0xff] %v1518_v8 }
 0x22b   : > { %1533 = vst [vmem:[%s2505_s30 + $0x50] sm:$0xff] %v1517_v31 }
 0x23a   : > { %v1785_v33 = vpop.f32.mrb[4].mxu0 }
 0x23b   : > { %v1390_v22 = vadd.f32 %v1785_v33, %v3449_v15  ;;  %v1384_v30 = vpop.f32.mrb[5].mxu0 }
 0x23c   : > { %v1385_v44 = vadd.f32 %v3449_v15, %v1384_v30 }
 0x23d   : > { %v1448_v62 = vadd.f32 3.0, %v1390_v22 }
 0x23e   : > { %v1447_v28 = vadd.f32 3.0, %v1385_v44 }
 0x23f   : > { %v1464_v63 = vmax.f32 %v1448_v62, 0.0 }
 0x240   : > { %v1463_v19 = vmax.f32 %v1447_v28, 0.0 }
 0x241   : > { %v1480_v51 = vmin.f32 %v1464_v63, 6.0 }
 0x242   : > { %v1797_v46 = vpop.f32.mrb[4].mxu1  ;;  %v1479_v27 = vmin.f32 %v1463_v19, 6.0 }
 0x243   : > { %v1430_v7 = vadd.f32 %v1797_v46, %v3449_v15  ;;  %v1424_v43 = vpop.f32.mrb[5].mxu1  ;;  %v1496_v40 = vmul.f32 %v1480_v51, %v1390_v22 }
 0x244   : > { %v1425_v24 = vadd.f32 %v3449_v15, %v1424_v43  ;;  %v1495_v23 = vmul.f32 %v1479_v27, %v1385_v44 }
 0x245   : > { %v1456_v18 = vadd.f32 3.0, %v1430_v7  ;;  %v1512_v17 = vmul.f32 0.16666667, %v1496_v40 }
 0x246   : > { %v1455_v38 = vadd.f32 3.0, %v1425_v24  ;;  %v1511_v9 = vmul.f32 0.16666667, %v1495_v23 }
 0x247   : > { %v1472_v21 = vmax.f32 %v1456_v18, 0.0  ;;  %1528 = vst [vmem:[%s2505_s30 + $0x28] sm:$0xff] %v1512_v17 }
 0x248   : > { %v1471_v47 = vmax.f32 %v1455_v38, 0.0  ;;  %1527 = vst [vmem:[%s2505_s30 + $0x20] sm:$0xff] %v1511_v9 }
 0x249   : > { %v1488_v20 = vmin.f32 %v1472_v21, 6.0 }
 0x24a   : > { %v1487_v14 = vmin.f32 %v1471_v47, 6.0 }
 0x24b   : > { %v1504_v37 = vmul.f32 %v1488_v20, %v1430_v7 }
 0x24c   : > { %v1503_v49 = vmul.f32 %v1487_v14, %v1425_v24 }
 0x24d   : > { %v1520_v0 = vmul.f32 0.16666667, %v1504_v37 }
 0x24e   : > { %v1519_v50 = vmul.f32 0.16666667, %v1503_v49 }
 0x24f   : > { %1536 = vst [vmem:[%s2505_s30 + $0x68] sm:$0xff] %v1520_v0 }
 0x250   : > { %1535 = vst [vmem:[%s2505_s30 + $0x60] sm:$0xff] %v1519_v50 }
 0x25e   : > { %v1788_v60 = vpop.f32.mrb[6].mxu0 }
 0x25f   : > { %v1400_v5 = vadd.f32 %v1788_v60, %v3449_v15  ;;  %v1394_v12 = vpop.f32.mrb[7].mxu0 }
 0x260   : > { %v1395_v53 = vadd.f32 %v3449_v15, %v1394_v12 }
 0x261   : > { %v1450_v2 = vadd.f32 3.0, %v1400_v5 }
 0x262   : > { %v1449_v32 = vadd.f32 3.0, %v1395_v53 }
 0x263   : > { %v1466_v54 = vmax.f32 %v1450_v2, 0.0  ;;  %v1800_v26 = vpop.f32.mrb[6].mxu1 }
 0x264   : > { %v1465_v52 = vmax.f32 %v1449_v32, 0.0  ;;  %v1440_v39 = vadd.f32 %v1800_v26, %v3449_v15  ;;  %v1434_v34 = vpop.f32.mrb[7].mxu1 }
 0x265   : > { %v1482_v56 = vmin.f32 %v1466_v54, 6.0  ;;  %v1435_v4 = vadd.f32 %v3449_v15, %v1434_v34 }
 0x266   : > { %v1481_v25 = vmin.f32 %v1465_v52, 6.0  ;;  %v1458_v58 = vadd.f32 3.0, %v1440_v39 }
 0x267   : > { %v1498_v11 = vmul.f32 %v1482_v56, %v1400_v5  ;;  %v1457_v29 = vadd.f32 3.0, %v1435_v4 }
 0x268   : > { %v1497_v41 = vmul.f32 %v1481_v25, %v1395_v53  ;;  %v1474_v6 = vmax.f32 %v1458_v58, 0.0 }
 0x269   : > { %v1514_v57 = vmul.f32 0.16666667, %v1498_v11  ;;  %v1473_v13 = vmax.f32 %v1457_v29, 0.0 }
 0x26a   : > { %v1513_v10 = vmul.f32 0.16666667, %v1497_v41  ;;  %v1490_v61 = vmin.f32 %v1474_v6, 6.0 }
 0x26b   : > { %1530 = vst [vmem:[%s2505_s30 + $0x38] sm:$0xff] %v1514_v57  ;;  %v1489_v15 = vmin.f32 %v1473_v13, 6.0 }
 0x26c   : > { %1529 = vst [vmem:[%s2505_s30 + $0x30] sm:$0xff] %v1513_v10  ;;  %v1506_v1 = vmul.f32 %v1490_v61, %v1440_v39 }
 0x26d   : > { %v1505_v45 = vmul.f32 %v1489_v15, %v1435_v4 }
 0x26e   : > { %v1522_v48 = vmul.f32 0.16666667, %v1506_v1 }
 0x26f   : > { %v1521_v35 = vmul.f32 0.16666667, %v1505_v45 }
 0x270   : > { %1538 = vst [vmem:[%s2505_s30 + $0x78] sm:$0xff] %v1522_v48 }
 0x271   : > { %1537 = vst [vmem:[%s2505_s30 + $0x70] sm:$0xff] %v1521_v35 }
 0x272   : > { %2109 = shalt.err (!%p2106_p5)
}
 0x273   : > { %s2110_s30 = scalar_lea.hbm %s3487_s18, 2048  ;;  %s2114_s17 = scalar_lea.hbm %s3620_s29, 8192 }
 0x274   : > { %p2111_p9 = scmp.ne.s32.totalorder %s3487_s18, %s2110_s30  ;;  %p2115_p10 = scmp.lt.u32.totalorder %s3487_s18, %s3620_s29 }
 0x275   : > { %p2116_p8 = scmp.lt.u32.totalorder %s2114_s17, %s2110_s30  ;;  %p2118_p3 = scmp.lt.u32.totalorder %s2110_s30, %s3487_s18 }
 0x276   : > { %p2112_p0 = pnand %p2111_p9, %p2396_p6 }
 0x277   : > { %p2117_p13 = por %p2116_p8, %p2115_p10 }
 0x278   : > { %p2113_p2 = pneg %p2112_p0 }
 0x279   : > { %p2119_p4 = por %p2118_p3, %p2117_p13 }
 0x27b   : > { %p2120_p7 = pnand %p2119_p4, %p2113_p2 }
 0x27d   : > { %2123 = shalt.err (!%p2120_p7)
}
 0x27e   : > { %s2219_s13 = smov 128   ;;  %s2220_s3 = smov 8  }
 0x27f   : > { %1859 = dma.vmem_to_hbm [thread:$0]  (%p2396_p6), %s3489_s10, 2048, %s3487_s18, %s1540_s14, %s2219_s13, %s2219_s13, %s2220_s3  }
 0x280 PF: > { %s3621_s21 = sld [smem:[#allocation23_spill]]  ;;  %s3622_s22 = sld [smem:[#allocation24_spill]] }
 0x281   : > { %p1881_p12 = scmp.ge.s32.totalorder %s2202_s25, 2 }
 0x286   : > { %s1571_s12 = sand.u32 1, %s3621_s21   ;;  %p3623_p11 = scmp.ne.s32.totalorder %s3622_s22, 0 }
 0x287   : > { %s1572_s7 = scalar_lea.sflag [#allocation5], %s1571_s12 }
 0x288   : > { %p1873_p1 = pnand %p1881_p12, %p3623_p11 }
 0x28a   : > { %2169 = dma.done.wait (!%p1873_p1), %s1572_s7, 2048  }
 0x28b   : > { %2171 = vsyncadd (!%p1873_p1), %s1572_s7, 4294965248  ;;  %s22_s25 = sadd.s32 1, %s2202_s25   ;;  %s3624_s6 = sld [smem:[#allocation25_spill]] }
 0x28c   : > { %p19_p5 = scmp.ge.s32.totalorder %s22_s25, 6   ;;  %s3625_s18 = smov %s2178_s19 }
 0x28d   : > { %s3626_s19 = smov %s2182_s20  ;;  %s3627_s20 = smov %s2409_s2 }
 0x28e   : > { %s3628_s21 = smov %s2194_s23  ;;  %s3629_s22 = smov %s2198_s24 }
 0x28f   : > { %s3631_s24 = smov %s3637_s15  ;;  %21 = sbr.rel (!%p19_p5) target bundleno = 12 (0xc), region = 121 }
 0x291   : > { %s3630_s23 = smov %s3624_s6 }
 0x296   :  { %1577 = vsyncpa [#allocation4], 1 }
 0x297   :  { %1579 = vsyncpa [#allocation4 + $0x1], 1 }
 0x298   :  { %1580 = vsyncpa [#allocation7], 1 }
 0x299   :  { %1581 = vsyncpa [#allocation5], 1 }
 0x29a   :  { %1583 = vsyncpa [#allocation5 + $0x1], 1 }

</bundles_post_ra>
